<compile_context>
chip_gen: v7x
topology: tpu7x:2x2x1
jax: 0.10.0
libtpu: 0.0.40
codegen_flags: <defaults>
</compile_context>

<pallas_src>
import functools

import jax
import jax.numpy as jnp
import numpy as np
from jax import lax
from jax.experimental import pallas as pl
from jax.experimental.pallas import tpu as pltpu


# ----------------------------- Fused kernel ----------------------------------
def _adam_kernel(x_ref, w1_ref, w2_ref, wc_ref, o_ref, *, width):
    # x_ref / o_ref : (1, C, HW) io_dtype, lane-dense (HW on the lane axis).
    # w1_ref        : (Cr, C) f32 VMEM   (fc1 weight, 1x1 conv, no bias)
    # w2_ref        : (C, Cr) f32 VMEM   (fc2 weight, 1x1 conv, no bias)
    # wc_ref        : (2, 49) f32 VMEM   spatial 7x7 conv weight, [ch, i*7 + j]
    x = x_ref[0].astype(jnp.float32)                                 # (C, HW)
    c, hw = x.shape
    wd = width
    wd_f = float(wd)

    # ---- Channel attention: shared MLP over avg- and max-pooled vectors ----
    avg_p = jnp.sum(x, axis=1, keepdims=True) * (1.0 / float(hw))    # (C, 1)
    max_p = jnp.max(x, axis=1, keepdims=True)                        # (C, 1)
    pooled = jnp.concatenate([avg_p, max_p], axis=1)                 # (C, 2)
    hid = jnp.maximum(
        jnp.dot(w1_ref[...], pooled, preferred_element_type=jnp.float32), 0.0)  # (Cr, 2)
    mlp = jnp.dot(w2_ref[...], hid, preferred_element_type=jnp.float32)          # (C, 2)
    ca = jax.nn.sigmoid(mlp[:, 0:1] + mlp[:, 1:2])                   # (C, 1)

    # Park x1 = x * ca in the output VMEM block; re-read it for the channel
    # reductions and for the final multiply (keeps no (C, HW) value live
    # across the unrolled conv loop).
    o_ref[0] = (x * ca).astype(o_ref.dtype)
    x1 = o_ref[0].astype(jnp.float32)                                # (C, HW)

    # ---- Spatial attention: 7x7 conv over stacked channel-avg / max maps ----
    avg_map = jnp.sum(x1, axis=0, keepdims=True) * (1.0 / float(c))  # (1, HW)
    max_map = jnp.max(x1, axis=0, keepdims=True)                     # (1, HW)
    maps = jnp.concatenate([avg_map, max_map], axis=0)               # (2, HW), 2 sublanes

    # Flat zero pad of 3*W + 3 on each side: tap (i, j) is a static lane slice
    # at offset i*W + j.  Horizontal out-of-bounds (and the row-wrap reads,
    # which land exactly on those columns) are zeroed by one column predicate
    # per tap column j != 3.
    zpad = jnp.zeros((2, 3 * wd + 3), jnp.float32)
    padded = jnp.concatenate([zpad, maps, zpad], axis=1)             # (2, HW + 6W + 6)

    wflat = wc_ref[...]                                              # (2, 49)

    # Column index (p % W) as f32; the +0.5/W guard makes floor exact even if
    # the vector divide is not correctly rounded.
    pos = lax.broadcasted_iota(jnp.int32, (2, hw), 1).astype(jnp.float32)
    col = pos - jnp.floor(pos / wd_f + 0.5 / wd_f) * wd_f            # (2, HW)

    acc = jnp.zeros((2, hw), jnp.float32)
    for j in range(7):                               # tap column
        part = wflat[:, j:j + 1] * padded[:, j:j + hw]               # i = 0
        for i in range(1, 7):                        # tap row
            k = i * wd + j                           # static flat shift
            t = i * 7 + j
            part = part + wflat[:, t:t + 1] * padded[:, k:k + hw]    # both channels / op
        if j < 3:
            part = jnp.where(col >= float(3 - j), part, 0.0)
        elif j > 3:
            part = jnp.where(col <= float(wd - 1 + 3 - j), part, 0.0)
        acc = acc + part

    conv = acc[0:1, :] + acc[1:2, :]                                 # (1, HW) channel sum
    sa = jax.nn.sigmoid(conv)                                        # (1, HW)

    # Final multiply re-reads the parked x1 from the output block.
    o_ref[0] = (o_ref[0].astype(jnp.float32) * sa).astype(o_ref.dtype)


# ----------------------------- Wrapper ---------------------------------------
def adam_forward(x, w1, w2, wconv, *, io_dtype=None):
    """ADAM forward.

    x: (B, C, H, W); w1: (C//r, C); w2: (C, C//r); wconv: (1, 2, 7, 7).
    io_dtype: dtype of the big-tensor HBM I/O (e.g. jnp.bfloat16 halves HBM
    bytes); all internal compute stays f32.
    """
    B, C, H, W = x.shape
    Cr = w1.shape[0]
    HW = H * W
    io_dtype = jnp.dtype(io_dtype) if io_dtype is not None else x.dtype

    x_flat = x.reshape(B, C, HW).astype(io_dtype)    # lane-dense presentation
    w1f = w1.astype(jnp.float32)
    w2f = w2.astype(jnp.float32)
    wc2 = wconv.reshape(2, 49).astype(jnp.float32)   # [ch, i*7 + j]

    # Per-step VMEM footprint ~ 2x input slab (double-buffer) + 2x output slab
    # + maps/weights.  Budget it explicitly.
    slab = C * HW * jnp.dtype(io_dtype).itemsize
    vmem_limit = int(max(32 * 2**20, min(100 * 2**20, 5 * slab + (4 << 20))))

    kernel = functools.partial(_adam_kernel, width=W)
    out_flat = pl.pallas_call(
        kernel,
        out_shape=jax.ShapeDtypeStruct((B, C, HW), io_dtype),
        grid=(B,),
        in_specs=[
            pl.BlockSpec((1, C, HW), lambda b: (b, 0, 0)),
            pl.BlockSpec((Cr, C), lambda b: (0, 0)),
            pl.BlockSpec((C, Cr), lambda b: (0, 0)),
            pl.BlockSpec((2, 49), lambda b: (0, 0)),
        ],
        out_specs=pl.BlockSpec((1, C, HW), lambda b: (b, 0, 0)),
        compiler_params=pltpu.CompilerParams(
            dimension_semantics=("parallel",),
            vmem_limit_bytes=vmem_limit),
    )(x_flat, w1f, w2f, wc2)
    return out_flat.reshape(B, C, H, W)


# ----------------------------- Pure-JAX reference ----------------------------
def adam_reference(x, w1, w2, wconv):
    avg = x.mean(axis=(2, 3))                           # (B, C)
    mx = x.max(axis=(2, 3))                             # (B, C)

    def mlp(p):
        h = jnp.maximum(p @ w1.T, 0.0)
        return h @ w2.T

    ca = jax.nn.sigmoid(mlp(avg) + mlp(mx))             # (B, C)
    x1 = x * ca[:, :, None, None]

    avg_map = x1.mean(axis=1, keepdims=True)
    max_map = x1.max(axis=1, keepdims=True)
    cat = jnp.concatenate([avg_map, max_map], axis=1)   # (B, 2, H, W)
    conv = lax.conv_general_dilated(
        cat, wconv, window_strides=(1, 1), padding=((3, 3), (3, 3)),
        dimension_numbers=("NCHW", "OIHW", "NCHW"))     # (B, 1, H, W)
    sa = jax.nn.sigmoid(conv)
    return x1 * sa


if __name__ == "__main__":
    B, C, H, W = 2, 16, 16, 16
    ratio = 8
    Cr = C // ratio

    key = jax.random.PRNGKey(0)
    kx, k1, k2, k3 = jax.random.split(key, 4)
    x = jax.random.normal(kx, (B, C, H, W), dtype=jnp.float32)
    # Deterministic synthetic weights (shapes from the PyTorch module __init__).
    w1 = 0.3 * jax.random.normal(k1, (Cr, C), dtype=jnp.float32)          # fc1 (C->C/8), 1x1, no bias
    w2 = 0.3 * jax.random.normal(k2, (C, Cr), dtype=jnp.float32)          # fc2 (C/8->C), 1x1, no bias
    wconv = 0.1 * jax.random.normal(k3, (1, 2, 7, 7), dtype=jnp.float32)  # spatial 7x7, no bias

    ref = adam_reference(x, w1, w2, wconv)

    # f32 I/O path: matches the f32 reference tightly.
    out = jax.block_until_ready(adam_forward(x, w1, w2, wconv))
    np.testing.assert_allclose(np.asarray(out), np.asarray(ref), rtol=1e-4, atol=1e-4)

    # bf16 I/O path (half the HBM bytes); loose tolerance against the f32 ref.
    out_bf16 = jax.block_until_ready(
        adam_forward(x, w1, w2, wconv, io_dtype=jnp.bfloat16))
    np.testing.assert_allclose(np.asarray(out_bf16).astype(np.float32),
                               np.asarray(ref), rtol=0.1, atol=0.1)

    print("KERNEL_OK")
</pallas_src>

<mosaic_0001>
module attributes {stable_mosaic.version = 11 : i64} {
  func.func @_adam_kernel(%arg0: i32, %arg1: memref<1x16x256xf32, #tpu.memory_space<vmem>>, %arg2: memref<2x16xf32, #tpu.memory_space<vmem>>, %arg3: memref<16x2xf32, #tpu.memory_space<vmem>>, %arg4: memref<2x49xf32, #tpu.memory_space<vmem>>, %arg5: memref<1x16x256xf32, #tpu.memory_space<vmem>>) attributes {dimension_semantics = [#tpu.dimension_semantics<parallel>], iteration_bounds = array<i64: 2>, scalar_prefetch = 0 : i64, scratch_operands = 0 : i64, tpu.core_type = #tpu.core_type<tc>, window_params = [{transform_indices = @transform_0, window_bounds = array<i64: 1, 16, 256>}, {pipeline_mode = #tpu.pipeline_mode<synchronous>, transform_indices = @transform_1, window_bounds = array<i64: 2, 16>}, {pipeline_mode = #tpu.pipeline_mode<synchronous>, transform_indices = @transform_2, window_bounds = array<i64: 16, 2>}, {pipeline_mode = #tpu.pipeline_mode<synchronous>, transform_indices = @transform_3, window_bounds = array<i64: 2, 49>}, {transform_indices = @transform_4, window_bounds = array<i64: 1, 16, 256>}]} {
    %c0 = arith.constant 0 : index
    %c0_0 = arith.constant 0 : index
    %c0_1 = arith.constant 0 : index
    %0 = vector.load %arg1[%c0, %c0_0, %c0_1] : memref<1x16x256xf32, #tpu.memory_space<vmem>>, vector<1x16x256xf32>
    %1 = vector.shape_cast %0 : vector<1x16x256xf32> to vector<16x256xf32>
    %cst = arith.constant dense<0.000000e+00> : vector<16xf32>
    %2 = vector.multi_reduction <add>, %1, %cst [1] : vector<16x256xf32> to vector<16xf32>
    %3 = vector.shape_cast %2 : vector<16xf32> to vector<16x1xf32>
    %cst_2 = arith.constant 3.906250e-03 : f32
    %4 = vector.broadcast %cst_2 : f32 to vector<16x1xf32>
    %5 = arith.mulf %3, %4 : vector<16x1xf32>
    %cst_3 = arith.constant dense<0xFF800000> : vector<16xf32>
    %6 = vector.multi_reduction <maximumf>, %1, %cst_3 [1] : vector<16x256xf32> to vector<16xf32>
    %7 = vector.shape_cast %6 : vector<16xf32> to vector<16x1xf32>
    %8 = tpu.concatenate %5, %7 in 1 : vector<16x1xf32>, vector<16x1xf32> -> vector<16x2xf32>
    %c0_4 = arith.constant 0 : index
    %c0_5 = arith.constant 0 : index
    %9 = vector.load %arg2[%c0_4, %c0_5] : memref<2x16xf32, #tpu.memory_space<vmem>>, vector<2x16xf32>
    %cst_6 = arith.constant dense<0.000000e+00> : vector<2x2xf32>
    %10 = tpu.matmul %9, %8, %cst_6 {dimension_numbers = #tpu.dot_dimension_numbers<[1], [0], [0], [1], [0, 0, 1, 1], [], []>} : vector<2x16xf32>, vector<16x2xf32>, vector<2x2xf32> -> vector<2x2xf32>
    %cst_7 = arith.constant 0.000000e+00 : f32
    %11 = vector.broadcast %cst_7 : f32 to vector<2x2xf32>
    %12 = arith.maximumf %10, %11 : vector<2x2xf32>
    %c0_8 = arith.constant 0 : index
    %c0_9 = arith.constant 0 : index
    %13 = vector.load %arg3[%c0_8, %c0_9] : memref<16x2xf32, #tpu.memory_space<vmem>>, vector<16x2xf32>
    %cst_10 = arith.constant dense<0.000000e+00> : vector<16x2xf32>
    %14 = tpu.matmul %13, %12, %cst_10 {dimension_numbers = #tpu.dot_dimension_numbers<[1], [0], [0], [1], [0, 0, 1, 1], [], []>} : vector<16x2xf32>, vector<2x2xf32>, vector<16x2xf32> -> vector<16x2xf32>
    %15 = vector.extract_strided_slice %14 {offsets = [0, 0], sizes = [16, 1], strides = [1, 1]} : vector<16x2xf32> to vector<16x1xf32>
    %16 = vector.extract_strided_slice %14 {offsets = [0, 1], sizes = [16, 1], strides = [1, 1]} : vector<16x2xf32> to vector<16x1xf32>
    %17 = arith.addf %15, %16 : vector<16x1xf32>
    %18 = arith.negf %17 : vector<16x1xf32>
    %19 = math.exp %18 : vector<16x1xf32>
    %cst_11 = arith.constant 1.000000e+00 : f32
    %20 = vector.broadcast %cst_11 : f32 to vector<16x1xf32>
    %21 = arith.addf %20, %19 : vector<16x1xf32>
    %22 = arith.divf %20, %21 : vector<16x1xf32>
    %23 = vector.broadcast %22 : vector<16x1xf32> to vector<16x256xf32>
    %24 = arith.mulf %1, %23 : vector<16x256xf32>
    %c0_12 = arith.constant 0 : index
    %c0_13 = arith.constant 0 : index
    %c0_14 = arith.constant 0 : index
    %25 = vector.load %arg5[%c0_12, %c0_13, %c0_14] : memref<1x16x256xf32, #tpu.memory_space<vmem>>, vector<1x16x256xf32>
    %26 = vector.shape_cast %25 : vector<1x16x256xf32> to vector<16x256xf32>
    %27 = vector.shape_cast %24 : vector<16x256xf32> to vector<1x16x256xf32>
    tpu.vector_store %arg5[%c0_12, %c0_13, %c0_14], %27 {strides = array<i32>} : memref<1x16x256xf32, #tpu.memory_space<vmem>>, vector<1x16x256xf32>,
    %c0_15 = arith.constant 0 : index
    %c0_16 = arith.constant 0 : index
    %c0_17 = arith.constant 0 : index
    %28 = vector.load %arg5[%c0_15, %c0_16, %c0_17] : memref<1x16x256xf32, #tpu.memory_space<vmem>>, vector<1x16x256xf32>
    %29 = vector.shape_cast %28 : vector<1x16x256xf32> to vector<16x256xf32>
    %cst_18 = arith.constant dense<0.000000e+00> : vector<256xf32>
    %30 = vector.multi_reduction <add>, %29, %cst_18 [0] : vector<16x256xf32> to vector<256xf32>
    %31 = vector.shape_cast %30 : vector<256xf32> to vector<1x256xf32>
    %cst_19 = arith.constant 6.250000e-02 : f32
    %32 = vector.broadcast %cst_19 : f32 to vector<1x256xf32>
    %33 = arith.mulf %31, %32 : vector<1x256xf32>
    %cst_20 = arith.constant dense<0xFF800000> : vector<256xf32>
    %34 = vector.multi_reduction <maximumf>, %29, %cst_20 [0] : vector<16x256xf32> to vector<256xf32>
    %35 = vector.shape_cast %34 : vector<256xf32> to vector<1x256xf32>
    %36 = tpu.concatenate %33, %35 in 0 : vector<1x256xf32>, vector<1x256xf32> -> vector<2x256xf32>
    %cst_21 = arith.constant 0.000000e+00 : f32
    %37 = vector.broadcast %cst_21 : f32 to vector<2x51xf32>
    %38 = tpu.concatenate %37, %36, %37 in 1 : vector<2x51xf32>, vector<2x256xf32>, vector<2x51xf32> -> vector<2x358xf32>
    %c0_22 = arith.constant 0 : index
    %c0_23 = arith.constant 0 : index
    %39 = vector.load %arg4[%c0_22, %c0_23] : memref<2x49xf32, #tpu.memory_space<vmem>>, vector<2x49xf32>
    %40 = tpu.iota {dimensions = array<i32: 1>} : vector<2x256xi32>
    %41 = arith.sitofp %40 : vector<2x256xi32> to vector<2x256xf32>
    %cst_24 = arith.constant 1.600000e+01 : f32
    %42 = vector.broadcast %cst_24 : f32 to vector<2x256xf32>
    %43 = arith.divf %41, %42 : vector<2x256xf32>
    %cst_25 = arith.constant 3.125000e-02 : f32
    %44 = vector.broadcast %cst_25 : f32 to vector<2x256xf32>
    %45 = arith.addf %43, %44 : vector<2x256xf32>
    %46 = math.floor %45 : vector<2x256xf32>
    %cst_26 = arith.constant 1.600000e+01 : f32
    %47 = vector.broadcast %cst_26 : f32 to vector<2x256xf32>
    %48 = arith.mulf %46, %47 : vector<2x256xf32>
    %49 = arith.subf %41, %48 : vector<2x256xf32>
    %cst_27 = arith.constant 0.000000e+00 : f32
    %50 = vector.broadcast %cst_27 : f32 to vector<2x256xf32>
    %51 = vector.extract_strided_slice %39 {offsets = [0, 0], sizes = [2, 1], strides = [1, 1]} : vector<2x49xf32> to vector<2x1xf32>
    %52 = vector.extract_strided_slice %38 {offsets = [0, 0], sizes = [2, 256], strides = [1, 1]} : vector<2x358xf32> to vector<2x256xf32>
    %53 = vector.broadcast %51 : vector<2x1xf32> to vector<2x256xf32>
    %54 = arith.mulf %53, %52 : vector<2x256xf32>
    %55 = vector.extract_strided_slice %39 {offsets = [0, 7], sizes = [2, 1], strides = [1, 1]} : vector<2x49xf32> to vector<2x1xf32>
    %56 = vector.extract_strided_slice %38 {offsets = [0, 16], sizes = [2, 256], strides = [1, 1]} : vector<2x358xf32> to vector<2x256xf32>
    %57 = vector.broadcast %55 : vector<2x1xf32> to vector<2x256xf32>
    %58 = arith.mulf %57, %56 : vector<2x256xf32>
    %59 = arith.addf %54, %58 : vector<2x256xf32>
    %60 = vector.extract_strided_slice %39 {offsets = [0, 14], sizes = [2, 1], strides = [1, 1]} : vector<2x49xf32> to vector<2x1xf32>
    %61 = vector.extract_strided_slice %38 {offsets = [0, 32], sizes = [2, 256], strides = [1, 1]} : vector<2x358xf32> to vector<2x256xf32>
    %62 = vector.broadcast %60 : vector<2x1xf32> to vector<2x256xf32>
    %63 = arith.mulf %62, %61 : vector<2x256xf32>
    %64 = arith.addf %59, %63 : vector<2x256xf32>
    %65 = vector.extract_strided_slice %39 {offsets = [0, 21], sizes = [2, 1], strides = [1, 1]} : vector<2x49xf32> to vector<2x1xf32>
    %66 = vector.extract_strided_slice %38 {offsets = [0, 48], sizes = [2, 256], strides = [1, 1]} : vector<2x358xf32> to vector<2x256xf32>
    %67 = vector.broadcast %65 : vector<2x1xf32> to vector<2x256xf32>
    %68 = arith.mulf %67, %66 : vector<2x256xf32>
    %69 = arith.addf %64, %68 : vector<2x256xf32>
    %70 = vector.extract_strided_slice %39 {offsets = [0, 28], sizes = [2, 1], strides = [1, 1]} : vector<2x49xf32> to vector<2x1xf32>
    %71 = vector.extract_strided_slice %38 {offsets = [0, 64], sizes = [2, 256], strides = [1, 1]} : vector<2x358xf32> to vector<2x256xf32>
    %72 = vector.broadcast %70 : vector<2x1xf32> to vector<2x256xf32>
    %73 = arith.mulf %72, %71 : vector<2x256xf32>
    %74 = arith.addf %69, %73 : vector<2x256xf32>
    %75 = vector.extract_strided_slice %39 {offsets = [0, 35], sizes = [2, 1], strides = [1, 1]} : vector<2x49xf32> to vector<2x1xf32>
    %76 = vector.extract_strided_slice %38 {offsets = [0, 80], sizes = [2, 256], strides = [1, 1]} : vector<2x358xf32> to vector<2x256xf32>
    %77 = vector.broadcast %75 : vector<2x1xf32> to vector<2x256xf32>
    %78 = arith.mulf %77, %76 : vector<2x256xf32>
    %79 = arith.addf %74, %78 : vector<2x256xf32>
    %80 = vector.extract_strided_slice %39 {offsets = [0, 42], sizes = [2, 1], strides = [1, 1]} : vector<2x49xf32> to vector<2x1xf32>
    %81 = vector.extract_strided_slice %38 {offsets = [0, 96], sizes = [2, 256], strides = [1, 1]} : vector<2x358xf32> to vector<2x256xf32>
    %82 = vector.broadcast %80 : vector<2x1xf32> to vector<2x256xf32>
    %83 = arith.mulf %82, %81 : vector<2x256xf32>
    %84 = arith.addf %79, %83 : vector<2x256xf32>
    %cst_28 = arith.constant 3.000000e+00 : f32
    %85 = vector.broadcast %cst_28 : f32 to vector<2x256xf32>
    %86 = arith.cmpf oge, %49, %85 : vector<2x256xf32>
    %cst_29 = arith.constant 0.000000e+00 : f32
    %87 = vector.broadcast %cst_29 : f32 to vector<2x256xf32>
    %88 = arith.select %86, %84, %87 : vector<2x256xi1>, vector<2x256xf32>
    %89 = arith.addf %50, %88 : vector<2x256xf32>
    %90 = vector.extract_strided_slice %39 {offsets = [0, 1], sizes = [2, 1], strides = [1, 1]} : vector<2x49xf32> to vector<2x1xf32>
    %91 = vector.extract_strided_slice %38 {offsets = [0, 1], sizes = [2, 256], strides = [1, 1]} : vector<2x358xf32> to vector<2x256xf32>
    %92 = vector.broadcast %90 : vector<2x1xf32> to vector<2x256xf32>
    %93 = arith.mulf %92, %91 : vector<2x256xf32>
    %94 = vector.extract_strided_slice %39 {offsets = [0, 8], sizes = [2, 1], strides = [1, 1]} : vector<2x49xf32> to vector<2x1xf32>
    %95 = vector.extract_strided_slice %38 {offsets = [0, 17], sizes = [2, 256], strides = [1, 1]} : vector<2x358xf32> to vector<2x256xf32>
    %96 = vector.broadcast %94 : vector<2x1xf32> to vector<2x256xf32>
    %97 = arith.mulf %96, %95 : vector<2x256xf32>
    %98 = arith.addf %93, %97 : vector<2x256xf32>
    %99 = vector.extract_strided_slice %39 {offsets = [0, 15], sizes = [2, 1], strides = [1, 1]} : vector<2x49xf32> to vector<2x1xf32>
    %100 = vector.extract_strided_slice %38 {offsets = [0, 33], sizes = [2, 256], strides = [1, 1]} : vector<2x358xf32> to vector<2x256xf32>
    %101 = vector.broadcast %99 : vector<2x1xf32> to vector<2x256xf32>
    %102 = arith.mulf %101, %100 : vector<2x256xf32>
    %103 = arith.addf %98, %102 : vector<2x256xf32>
    %104 = vector.extract_strided_slice %39 {offsets = [0, 22], sizes = [2, 1], strides = [1, 1]} : vector<2x49xf32> to vector<2x1xf32>
    %105 = vector.extract_strided_slice %38 {offsets = [0, 49], sizes = [2, 256], strides = [1, 1]} : vector<2x358xf32> to vector<2x256xf32>
    %106 = vector.broadcast %104 : vector<2x1xf32> to vector<2x256xf32>
    %107 = arith.mulf %106, %105 : vector<2x256xf32>
    %108 = arith.addf %103, %107 : vector<2x256xf32>
    %109 = vector.extract_strided_slice %39 {offsets = [0, 29], sizes = [2, 1], strides = [1, 1]} : vector<2x49xf32> to vector<2x1xf32>
    %110 = vector.extract_strided_slice %38 {offsets = [0, 65], sizes = [2, 256], strides = [1, 1]} : vector<2x358xf32> to vector<2x256xf32>
    %111 = vector.broadcast %109 : vector<2x1xf32> to vector<2x256xf32>
    %112 = arith.mulf %111, %110 : vector<2x256xf32>
    %113 = arith.addf %108, %112 : vector<2x256xf32>
    %114 = vector.extract_strided_slice %39 {offsets = [0, 36], sizes = [2, 1], strides = [1, 1]} : vector<2x49xf32> to vector<2x1xf32>
    %115 = vector.extract_strided_slice %38 {offsets = [0, 81], sizes = [2, 256], strides = [1, 1]} : vector<2x358xf32> to vector<2x256xf32>
    %116 = vector.broadcast %114 : vector<2x1xf32> to vector<2x256xf32>
    %117 = arith.mulf %116, %115 : vector<2x256xf32>
    %118 = arith.addf %113, %117 : vector<2x256xf32>
    %119 = vector.extract_strided_slice %39 {offsets = [0, 43], sizes = [2, 1], strides = [1, 1]} : vector<2x49xf32> to vector<2x1xf32>
    %120 = vector.extract_strided_slice %38 {offsets = [0, 97], sizes = [2, 256], strides = [1, 1]} : vector<2x358xf32> to vector<2x256xf32>
    %121 = vector.broadcast %119 : vector<2x1xf32> to vector<2x256xf32>
    %122 = arith.mulf %121, %120 : vector<2x256xf32>
    %123 = arith.addf %118, %122 : vector<2x256xf32>
    %cst_30 = arith.constant 2.000000e+00 : f32
    %124 = vector.broadcast %cst_30 : f32 to vector<2x256xf32>
    %125 = arith.cmpf oge, %49, %124 : vector<2x256xf32>
    %cst_31 = arith.constant 0.000000e+00 : f32
    %126 = vector.broadcast %cst_31 : f32 to vector<2x256xf32>
    %127 = arith.select %125, %123, %126 : vector<2x256xi1>, vector<2x256xf32>
    %128 = arith.addf %89, %127 : vector<2x256xf32>
    %129 = vector.extract_strided_slice %39 {offsets = [0, 2], sizes = [2, 1], strides = [1, 1]} : vector<2x49xf32> to vector<2x1xf32>
    %130 = vector.extract_strided_slice %38 {offsets = [0, 2], sizes = [2, 256], strides = [1, 1]} : vector<2x358xf32> to vector<2x256xf32>
    %131 = vector.broadcast %129 : vector<2x1xf32> to vector<2x256xf32>
    %132 = arith.mulf %131, %130 : vector<2x256xf32>
    %133 = vector.extract_strided_slice %39 {offsets = [0, 9], sizes = [2, 1], strides = [1, 1]} : vector<2x49xf32> to vector<2x1xf32>
    %134 = vector.extract_strided_slice %38 {offsets = [0, 18], sizes = [2, 256], strides = [1, 1]} : vector<2x358xf32> to vector<2x256xf32>
    %135 = vector.broadcast %133 : vector<2x1xf32> to vector<2x256xf32>
    %136 = arith.mulf %135, %134 : vector<2x256xf32>
    %137 = arith.addf %132, %136 : vector<2x256xf32>
    %138 = vector.extract_strided_slice %39 {offsets = [0, 16], sizes = [2, 1], strides = [1, 1]} : vector<2x49xf32> to vector<2x1xf32>
    %139 = vector.extract_strided_slice %38 {offsets = [0, 34], sizes = [2, 256], strides = [1, 1]} : vector<2x358xf32> to vector<2x256xf32>
    %140 = vector.broadcast %138 : vector<2x1xf32> to vector<2x256xf32>
    %141 = arith.mulf %140, %139 : vector<2x256xf32>
    %142 = arith.addf %137, %141 : vector<2x256xf32>
    %143 = vector.extract_strided_slice %39 {offsets = [0, 23], sizes = [2, 1], strides = [1, 1]} : vector<2x49xf32> to vector<2x1xf32>
    %144 = vector.extract_strided_slice %38 {offsets = [0, 50], sizes = [2, 256], strides = [1, 1]} : vector<2x358xf32> to vector<2x256xf32>
    %145 = vector.broadcast %143 : vector<2x1xf32> to vector<2x256xf32>
    %146 = arith.mulf %145, %144 : vector<2x256xf32>
    %147 = arith.addf %142, %146 : vector<2x256xf32>
    %148 = vector.extract_strided_slice %39 {offsets = [0, 30], sizes = [2, 1], strides = [1, 1]} : vector<2x49xf32> to vector<2x1xf32>
    %149 = vector.extract_strided_slice %38 {offsets = [0, 66], sizes = [2, 256], strides = [1, 1]} : vector<2x358xf32> to vector<2x256xf32>
    %150 = vector.broadcast %148 : vector<2x1xf32> to vector<2x256xf32>
    %151 = arith.mulf %150, %149 : vector<2x256xf32>
    %152 = arith.addf %147, %151 : vector<2x256xf32>
    %153 = vector.extract_strided_slice %39 {offsets = [0, 37], sizes = [2, 1], strides = [1, 1]} : vector<2x49xf32> to vector<2x1xf32>
    %154 = vector.extract_strided_slice %38 {offsets = [0, 82], sizes = [2, 256], strides = [1, 1]} : vector<2x358xf32> to vector<2x256xf32>
    %155 = vector.broadcast %153 : vector<2x1xf32> to vector<2x256xf32>
    %156 = arith.mulf %155, %154 : vector<2x256xf32>
    %157 = arith.addf %152, %156 : vector<2x256xf32>
    %158 = vector.extract_strided_slice %39 {offsets = [0, 44], sizes = [2, 1], strides = [1, 1]} : vector<2x49xf32> to vector<2x1xf32>
    %159 = vector.extract_strided_slice %38 {offsets = [0, 98], sizes = [2, 256], strides = [1, 1]} : vector<2x358xf32> to vector<2x256xf32>
    %160 = vector.broadcast %158 : vector<2x1xf32> to vector<2x256xf32>
    %161 = arith.mulf %160, %159 : vector<2x256xf32>
    %162 = arith.addf %157, %161 : vector<2x256xf32>
    %cst_32 = arith.constant 1.000000e+00 : f32
    %163 = vector.broadcast %cst_32 : f32 to vector<2x256xf32>
    %164 = arith.cmpf oge, %49, %163 : vector<2x256xf32>
    %cst_33 = arith.constant 0.000000e+00 : f32
    %165 = vector.broadcast %cst_33 : f32 to vector<2x256xf32>
    %166 = arith.select %164, %162, %165 : vector<2x256xi1>, vector<2x256xf32>
    %167 = arith.addf %128, %166 : vector<2x256xf32>
    %168 = vector.extract_strided_slice %39 {offsets = [0, 3], sizes = [2, 1], strides = [1, 1]} : vector<2x49xf32> to vector<2x1xf32>
    %169 = vector.extract_strided_slice %38 {offsets = [0, 3], sizes = [2, 256], strides = [1, 1]} : vector<2x358xf32> to vector<2x256xf32>
    %170 = vector.broadcast %168 : vector<2x1xf32> to vector<2x256xf32>
    %171 = arith.mulf %170, %169 : vector<2x256xf32>
    %172 = vector.extract_strided_slice %39 {offsets = [0, 10], sizes = [2, 1], strides = [1, 1]} : vector<2x49xf32> to vector<2x1xf32>
    %173 = vector.extract_strided_slice %38 {offsets = [0, 19], sizes = [2, 256], strides = [1, 1]} : vector<2x358xf32> to vector<2x256xf32>
    %174 = vector.broadcast %172 : vector<2x1xf32> to vector<2x256xf32>
    %175 = arith.mulf %174, %173 : vector<2x256xf32>
    %176 = arith.addf %171, %175 : vector<2x256xf32>
    %177 = vector.extract_strided_slice %39 {offsets = [0, 17], sizes = [2, 1], strides = [1, 1]} : vector<2x49xf32> to vector<2x1xf32>
    %178 = vector.extract_strided_slice %38 {offsets = [0, 35], sizes = [2, 256], strides = [1, 1]} : vector<2x358xf32> to vector<2x256xf32>
    %179 = vector.broadcast %177 : vector<2x1xf32> to vector<2x256xf32>
    %180 = arith.mulf %179, %178 : vector<2x256xf32>
    %181 = arith.addf %176, %180 : vector<2x256xf32>
    %182 = vector.extract_strided_slice %39 {offsets = [0, 24], sizes = [2, 1], strides = [1, 1]} : vector<2x49xf32> to vector<2x1xf32>
    %183 = vector.extract_strided_slice %38 {offsets = [0, 51], sizes = [2, 256], strides = [1, 1]} : vector<2x358xf32> to vector<2x256xf32>
    %184 = vector.broadcast %182 : vector<2x1xf32> to vector<2x256xf32>
    %185 = arith.mulf %184, %183 : vector<2x256xf32>
    %186 = arith.addf %181, %185 : vector<2x256xf32>
    %187 = vector.extract_strided_slice %39 {offsets = [0, 31], sizes = [2, 1], strides = [1, 1]} : vector<2x49xf32> to vector<2x1xf32>
    %188 = vector.extract_strided_slice %38 {offsets = [0, 67], sizes = [2, 256], strides = [1, 1]} : vector<2x358xf32> to vector<2x256xf32>
    %189 = vector.broadcast %187 : vector<2x1xf32> to vector<2x256xf32>
    %190 = arith.mulf %189, %188 : vector<2x256xf32>
    %191 = arith.addf %186, %190 : vector<2x256xf32>
    %192 = vector.extract_strided_slice %39 {offsets = [0, 38], sizes = [2, 1], strides = [1, 1]} : vector<2x49xf32> to vector<2x1xf32>
    %193 = vector.extract_strided_slice %38 {offsets = [0, 83], sizes = [2, 256], strides = [1, 1]} : vector<2x358xf32> to vector<2x256xf32>
    %194 = vector.broadcast %192 : vector<2x1xf32> to vector<2x256xf32>
    %195 = arith.mulf %194, %193 : vector<2x256xf32>
    %196 = arith.addf %191, %195 : vector<2x256xf32>
    %197 = vector.extract_strided_slice %39 {offsets = [0, 45], sizes = [2, 1], strides = [1, 1]} : vector<2x49xf32> to vector<2x1xf32>
    %198 = vector.extract_strided_slice %38 {offsets = [0, 99], sizes = [2, 256], strides = [1, 1]} : vector<2x358xf32> to vector<2x256xf32>
    %199 = vector.broadcast %197 : vector<2x1xf32> to vector<2x256xf32>
    %200 = arith.mulf %199, %198 : vector<2x256xf32>
    %201 = arith.addf %196, %200 : vector<2x256xf32>
    %202 = arith.addf %167, %201 : vector<2x256xf32>
    %203 = vector.extract_strided_slice %39 {offsets = [0, 4], sizes = [2, 1], strides = [1, 1]} : vector<2x49xf32> to vector<2x1xf32>
    %204 = vector.extract_strided_slice %38 {offsets = [0, 4], sizes = [2, 256], strides = [1, 1]} : vector<2x358xf32> to vector<2x256xf32>
    %205 = vector.broadcast %203 : vector<2x1xf32> to vector<2x256xf32>
    %206 = arith.mulf %205, %204 : vector<2x256xf32>
    %207 = vector.extract_strided_slice %39 {offsets = [0, 11], sizes = [2, 1], strides = [1, 1]} : vector<2x49xf32> to vector<2x1xf32>
    %208 = vector.extract_strided_slice %38 {offsets = [0, 20], sizes = [2, 256], strides = [1, 1]} : vector<2x358xf32> to vector<2x256xf32>
    %209 = vector.broadcast %207 : vector<2x1xf32> to vector<2x256xf32>
    %210 = arith.mulf %209, %208 : vector<2x256xf32>
    %211 = arith.addf %206, %210 : vector<2x256xf32>
    %212 = vector.extract_strided_slice %39 {offsets = [0, 18], sizes = [2, 1], strides = [1, 1]} : vector<2x49xf32> to vector<2x1xf32>
    %213 = vector.extract_strided_slice %38 {offsets = [0, 36], sizes = [2, 256], strides = [1, 1]} : vector<2x358xf32> to vector<2x256xf32>
    %214 = vector.broadcast %212 : vector<2x1xf32> to vector<2x256xf32>
    %215 = arith.mulf %214, %213 : vector<2x256xf32>
    %216 = arith.addf %211, %215 : vector<2x256xf32>
    %217 = vector.extract_strided_slice %39 {offsets = [0, 25], sizes = [2, 1], strides = [1, 1]} : vector<2x49xf32> to vector<2x1xf32>
    %218 = vector.extract_strided_slice %38 {offsets = [0, 52], sizes = [2, 256], strides = [1, 1]} : vector<2x358xf32> to vector<2x256xf32>
    %219 = vector.broadcast %217 : vector<2x1xf32> to vector<2x256xf32>
    %220 = arith.mulf %219, %218 : vector<2x256xf32>
    %221 = arith.addf %216, %220 : vector<2x256xf32>
    %222 = vector.extract_strided_slice %39 {offsets = [0, 32], sizes = [2, 1], strides = [1, 1]} : vector<2x49xf32> to vector<2x1xf32>
    %223 = vector.extract_strided_slice %38 {offsets = [0, 68], sizes = [2, 256], strides = [1, 1]} : vector<2x358xf32> to vector<2x256xf32>
    %224 = vector.broadcast %222 : vector<2x1xf32> to vector<2x256xf32>
    %225 = arith.mulf %224, %223 : vector<2x256xf32>
    %226 = arith.addf %221, %225 : vector<2x256xf32>
    %227 = vector.extract_strided_slice %39 {offsets = [0, 39], sizes = [2, 1], strides = [1, 1]} : vector<2x49xf32> to vector<2x1xf32>
    %228 = vector.extract_strided_slice %38 {offsets = [0, 84], sizes = [2, 256], strides = [1, 1]} : vector<2x358xf32> to vector<2x256xf32>
    %229 = vector.broadcast %227 : vector<2x1xf32> to vector<2x256xf32>
    %230 = arith.mulf %229, %228 : vector<2x256xf32>
    %231 = arith.addf %226, %230 : vector<2x256xf32>
    %232 = vector.extract_strided_slice %39 {offsets = [0, 46], sizes = [2, 1], strides = [1, 1]} : vector<2x49xf32> to vector<2x1xf32>
    %233 = vector.extract_strided_slice %38 {offsets = [0, 100], sizes = [2, 256], strides = [1, 1]} : vector<2x358xf32> to vector<2x256xf32>
    %234 = vector.broadcast %232 : vector<2x1xf32> to vector<2x256xf32>
    %235 = arith.mulf %234, %233 : vector<2x256xf32>
    %236 = arith.addf %231, %235 : vector<2x256xf32>
    %cst_34 = arith.constant 1.400000e+01 : f32
    %237 = vector.broadcast %cst_34 : f32 to vector<2x256xf32>
    %238 = arith.cmpf ole, %49, %237 : vector<2x256xf32>
    %cst_35 = arith.constant 0.000000e+00 : f32
    %239 = vector.broadcast %cst_35 : f32 to vector<2x256xf32>
    %240 = arith.select %238, %236, %239 : vector<2x256xi1>, vector<2x256xf32>
    %241 = arith.addf %202, %240 : vector<2x256xf32>
    %242 = vector.extract_strided_slice %39 {offsets = [0, 5], sizes = [2, 1], strides = [1, 1]} : vector<2x49xf32> to vector<2x1xf32>
    %243 = vector.extract_strided_slice %38 {offsets = [0, 5], sizes = [2, 256], strides = [1, 1]} : vector<2x358xf32> to vector<2x256xf32>
    %244 = vector.broadcast %242 : vector<2x1xf32> to vector<2x256xf32>
    %245 = arith.mulf %244, %243 : vector<2x256xf32>
    %246 = vector.extract_strided_slice %39 {offsets = [0, 12], sizes = [2, 1], strides = [1, 1]} : vector<2x49xf32> to vector<2x1xf32>
    %247 = vector.extract_strided_slice %38 {offsets = [0, 21], sizes = [2, 256], strides = [1, 1]} : vector<2x358xf32> to vector<2x256xf32>
    %248 = vector.broadcast %246 : vector<2x1xf32> to vector<2x256xf32>
    %249 = arith.mulf %248, %247 : vector<2x256xf32>
    %250 = arith.addf %245, %249 : vector<2x256xf32>
    %251 = vector.extract_strided_slice %39 {offsets = [0, 19], sizes = [2, 1], strides = [1, 1]} : vector<2x49xf32> to vector<2x1xf32>
    %252 = vector.extract_strided_slice %38 {offsets = [0, 37], sizes = [2, 256], strides = [1, 1]} : vector<2x358xf32> to vector<2x256xf32>
    %253 = vector.broadcast %251 : vector<2x1xf32> to vector<2x256xf32>
    %254 = arith.mulf %253, %252 : vector<2x256xf32>
    %255 = arith.addf %250, %254 : vector<2x256xf32>
    %256 = vector.extract_strided_slice %39 {offsets = [0, 26], sizes = [2, 1], strides = [1, 1]} : vector<2x49xf32> to vector<2x1xf32>
    %257 = vector.extract_strided_slice %38 {offsets = [0, 53], sizes = [2, 256], strides = [1, 1]} : vector<2x358xf32> to vector<2x256xf32>
    %258 = vector.broadcast %256 : vector<2x1xf32> to vector<2x256xf32>
    %259 = arith.mulf %258, %257 : vector<2x256xf32>
    %260 = arith.addf %255, %259 : vector<2x256xf32>
    %261 = vector.extract_strided_slice %39 {offsets = [0, 33], sizes = [2, 1], strides = [1, 1]} : vector<2x49xf32> to vector<2x1xf32>
    %262 = vector.extract_strided_slice %38 {offsets = [0, 69], sizes = [2, 256], strides = [1, 1]} : vector<2x358xf32> to vector<2x256xf32>
    %263 = vector.broadcast %261 : vector<2x1xf32> to vector<2x256xf32>
    %264 = arith.mulf %263, %262 : vector<2x256xf32>
    %265 = arith.addf %260, %264 : vector<2x256xf32>
    %266 = vector.extract_strided_slice %39 {offsets = [0, 40], sizes = [2, 1], strides = [1, 1]} : vector<2x49xf32> to vector<2x1xf32>
    %267 = vector.extract_strided_slice %38 {offsets = [0, 85], sizes = [2, 256], strides = [1, 1]} : vector<2x358xf32> to vector<2x256xf32>
    %268 = vector.broadcast %266 : vector<2x1xf32> to vector<2x256xf32>
    %269 = arith.mulf %268, %267 : vector<2x256xf32>
    %270 = arith.addf %265, %269 : vector<2x256xf32>
    %271 = vector.extract_strided_slice %39 {offsets = [0, 47], sizes = [2, 1], strides = [1, 1]} : vector<2x49xf32> to vector<2x1xf32>
    %272 = vector.extract_strided_slice %38 {offsets = [0, 101], sizes = [2, 256], strides = [1, 1]} : vector<2x358xf32> to vector<2x256xf32>
    %273 = vector.broadcast %271 : vector<2x1xf32> to vector<2x256xf32>
    %274 = arith.mulf %273, %272 : vector<2x256xf32>
    %275 = arith.addf %270, %274 : vector<2x256xf32>
    %cst_36 = arith.constant 1.300000e+01 : f32
    %276 = vector.broadcast %cst_36 : f32 to vector<2x256xf32>
    %277 = arith.cmpf ole, %49, %276 : vector<2x256xf32>
    %cst_37 = arith.constant 0.000000e+00 : f32
    %278 = vector.broadcast %cst_37 : f32 to vector<2x256xf32>
    %279 = arith.select %277, %275, %278 : vector<2x256xi1>, vector<2x256xf32>
    %280 = arith.addf %241, %279 : vector<2x256xf32>
    %281 = vector.extract_strided_slice %39 {offsets = [0, 6], sizes = [2, 1], strides = [1, 1]} : vector<2x49xf32> to vector<2x1xf32>
    %282 = vector.extract_strided_slice %38 {offsets = [0, 6], sizes = [2, 256], strides = [1, 1]} : vector<2x358xf32> to vector<2x256xf32>
    %283 = vector.broadcast %281 : vector<2x1xf32> to vector<2x256xf32>
    %284 = arith.mulf %283, %282 : vector<2x256xf32>
    %285 = vector.extract_strided_slice %39 {offsets = [0, 13], sizes = [2, 1], strides = [1, 1]} : vector<2x49xf32> to vector<2x1xf32>
    %286 = vector.extract_strided_slice %38 {offsets = [0, 22], sizes = [2, 256], strides = [1, 1]} : vector<2x358xf32> to vector<2x256xf32>
    %287 = vector.broadcast %285 : vector<2x1xf32> to vector<2x256xf32>
    %288 = arith.mulf %287, %286 : vector<2x256xf32>
    %289 = arith.addf %284, %288 : vector<2x256xf32>
    %290 = vector.extract_strided_slice %39 {offsets = [0, 20], sizes = [2, 1], strides = [1, 1]} : vector<2x49xf32> to vector<2x1xf32>
    %291 = vector.extract_strided_slice %38 {offsets = [0, 38], sizes = [2, 256], strides = [1, 1]} : vector<2x358xf32> to vector<2x256xf32>
    %292 = vector.broadcast %290 : vector<2x1xf32> to vector<2x256xf32>
    %293 = arith.mulf %292, %291 : vector<2x256xf32>
    %294 = arith.addf %289, %293 : vector<2x256xf32>
    %295 = vector.extract_strided_slice %39 {offsets = [0, 27], sizes = [2, 1], strides = [1, 1]} : vector<2x49xf32> to vector<2x1xf32>
    %296 = vector.extract_strided_slice %38 {offsets = [0, 54], sizes = [2, 256], strides = [1, 1]} : vector<2x358xf32> to vector<2x256xf32>
    %297 = vector.broadcast %295 : vector<2x1xf32> to vector<2x256xf32>
    %298 = arith.mulf %297, %296 : vector<2x256xf32>
    %299 = arith.addf %294, %298 : vector<2x256xf32>
    %300 = vector.extract_strided_slice %39 {offsets = [0, 34], sizes = [2, 1], strides = [1, 1]} : vector<2x49xf32> to vector<2x1xf32>
    %301 = vector.extract_strided_slice %38 {offsets = [0, 70], sizes = [2, 256], strides = [1, 1]} : vector<2x358xf32> to vector<2x256xf32>
    %302 = vector.broadcast %300 : vector<2x1xf32> to vector<2x256xf32>
    %303 = arith.mulf %302, %301 : vector<2x256xf32>
    %304 = arith.addf %299, %303 : vector<2x256xf32>
    %305 = vector.extract_strided_slice %39 {offsets = [0, 41], sizes = [2, 1], strides = [1, 1]} : vector<2x49xf32> to vector<2x1xf32>
    %306 = vector.extract_strided_slice %38 {offsets = [0, 86], sizes = [2, 256], strides = [1, 1]} : vector<2x358xf32> to vector<2x256xf32>
    %307 = vector.broadcast %305 : vector<2x1xf32> to vector<2x256xf32>
    %308 = arith.mulf %307, %306 : vector<2x256xf32>
    %309 = arith.addf %304, %308 : vector<2x256xf32>
    %310 = vector.extract_strided_slice %39 {offsets = [0, 48], sizes = [2, 1], strides = [1, 1]} : vector<2x49xf32> to vector<2x1xf32>
    %311 = vector.extract_strided_slice %38 {offsets = [0, 102], sizes = [2, 256], strides = [1, 1]} : vector<2x358xf32> to vector<2x256xf32>
    %312 = vector.broadcast %310 : vector<2x1xf32> to vector<2x256xf32>
    %313 = arith.mulf %312, %311 : vector<2x256xf32>
    %314 = arith.addf %309, %313 : vector<2x256xf32>
    %cst_38 = arith.constant 1.200000e+01 : f32
    %315 = vector.broadcast %cst_38 : f32 to vector<2x256xf32>
    %316 = arith.cmpf ole, %49, %315 : vector<2x256xf32>
    %cst_39 = arith.constant 0.000000e+00 : f32
    %317 = vector.broadcast %cst_39 : f32 to vector<2x256xf32>
    %318 = arith.select %316, %314, %317 : vector<2x256xi1>, vector<2x256xf32>
    %319 = arith.addf %280, %318 : vector<2x256xf32>
    %320 = vector.extract_strided_slice %319 {offsets = [0, 0], sizes = [1, 256], strides = [1, 1]} : vector<2x256xf32> to vector<1x256xf32>
    %321 = vector.extract_strided_slice %319 {offsets = [1, 0], sizes = [1, 256], strides = [1, 1]} : vector<2x256xf32> to vector<1x256xf32>
    %322 = arith.addf %320, %321 : vector<1x256xf32>
    %323 = arith.negf %322 : vector<1x256xf32>
    %324 = math.exp %323 : vector<1x256xf32>
    %cst_40 = arith.constant 1.000000e+00 : f32
    %325 = vector.broadcast %cst_40 : f32 to vector<1x256xf32>
    %326 = arith.addf %325, %324 : vector<1x256xf32>
    %327 = arith.divf %325, %326 : vector<1x256xf32>
    %c0_41 = arith.constant 0 : index
    %c0_42 = arith.constant 0 : index
    %c0_43 = arith.constant 0 : index
    %328 = vector.load %arg5[%c0_41, %c0_42, %c0_43] : memref<1x16x256xf32, #tpu.memory_space<vmem>>, vector<1x16x256xf32>
    %329 = vector.shape_cast %328 : vector<1x16x256xf32> to vector<16x256xf32>
    %330 = vector.broadcast %327 : vector<1x256xf32> to vector<16x256xf32>
    %331 = arith.mulf %329, %330 : vector<16x256xf32>
    %c0_44 = arith.constant 0 : index
    %c0_45 = arith.constant 0 : index
    %c0_46 = arith.constant 0 : index
    %332 = vector.load %arg5[%c0_44, %c0_45, %c0_46] : memref<1x16x256xf32, #tpu.memory_space<vmem>>, vector<1x16x256xf32>
    %333 = vector.shape_cast %332 : vector<1x16x256xf32> to vector<16x256xf32>
    %334 = vector.shape_cast %331 : vector<16x256xf32> to vector<1x16x256xf32>
    tpu.vector_store %arg5[%c0_44, %c0_45, %c0_46], %334 {strides = array<i32>} : memref<1x16x256xf32, #tpu.memory_space<vmem>>, vector<1x16x256xf32>,
    return
  }
  func.func @transform_0(%arg0: i32) -> (i32, i32, i32) {
    %c0_i32 = arith.constant 0 : i32
    %c0_i32_0 = arith.constant 0 : i32
    %c0_i32_1 = arith.constant 0 : i32
    return %arg0, %c0_i32, %c0_i32_0 : i32, i32, i32
  }
  func.func @transform_1(%arg0: i32) -> (i32, i32) {
    %c0_i32 = arith.constant 0 : i32
    %c0_i32_0 = arith.constant 0 : i32
    %c0_i32_1 = arith.constant 0 : i32
    return %c0_i32, %c0_i32_0 : i32, i32
  }
  func.func @transform_2(%arg0: i32) -> (i32, i32) {
    %c0_i32 = arith.constant 0 : i32
    %c0_i32_0 = arith.constant 0 : i32
    %c0_i32_1 = arith.constant 0 : i32
    return %c0_i32, %c0_i32_0 : i32, i32
  }
  func.func @transform_3(%arg0: i32) -> (i32, i32) {
    %c0_i32 = arith.constant 0 : i32
    %c0_i32_0 = arith.constant 0 : i32
    %c0_i32_1 = arith.constant 0 : i32
    return %c0_i32, %c0_i32_0 : i32, i32
  }
  func.func @transform_4(%arg0: i32) -> (i32, i32, i32) {
    %c0_i32 = arith.constant 0 : i32
    %c0_i32_0 = arith.constant 0 : i32
    %c0_i32_1 = arith.constant 0 : i32
    return %arg0, %c0_i32, %c0_i32_0 : i32, i32, i32
  }
}

</mosaic_0001>

<bundles_post_ra>
// kernel: tpu_custom_call.1
= control target key start
LH: loop header
LB: loop body
LE: loop exit
PB: predicated region body
PF: predicated region fallthrough
CT: control target
= control target key end

     0   :  { %9 = vsyncpa [#allocation3], 0  ;;  %s3446_s0 = inlined_call_operand.hbm [shape: f32[2,16,256], index: 0, kind: input, shape index: {}]   ;;  %s3447_s1 = inlined_call_operand.vmem [shape: f32[2,16], index: 1, kind: input, shape index: {}]   ;;  %s3448_s2 = inlined_call_operand.vmem [shape: f32[16,2], index: 2, kind: input, shape index: {}]   ;;  %s3449_s3 = inlined_call_operand.vmem [shape: f32[2,49], index: 3, kind: input, shape index: {}]   ;;  %s3450_s4 = inlined_call_operand.hbm [shape: f32[2,16,256], index: 4, kind: output, shape index: {}]  }
   0x1   :  { %11 = vsyncpa [#allocation3 + $0x1], 0 }
   0x2   :  { %12 = vsyncpa [#allocation4], 0 }
   0x3   :  { %14 = vsyncpa [#allocation4 + $0x1], 0  ;;  %s2225_s15 = smov 0   ;;  %s2227_s16 = smov 0  }
   0x4   :  { %s2229_s17 = smov 0   ;;  %s2231_s18 = smov 0  }
   0x5 LB: > { %s2246_s19 = sadd.s32 4294967295, %s2127_s18   ;;  %s1804_s20 = sadd.s32 4294967294, %s2127_s18   ;;  %s2127_s18 = sphi %s2231_s18, %s3551_s18   ;;  %s2123_s17 = sphi %s2229_s17, %s3550_s17   ;;  %s2119_s16 = sphi %s2227_s16, %s3549_s16   ;;  %s2115_s15 = sphi %s2225_s15, %s3548_s15  }
   0x6   : > { %s2250_s21 = sadd.s32 1, %s2127_s18   ;;  %s27_s22 = sadd.s32 1, %s2123_s17 }
   0x7   : > { %s24_s23 = ssub.s32 %s2127_s18, %s2250_s21  ;;  %p34_p0 = scmp.ne.s32.totalorder %s2123_s17, %s2119_s16 }
   0x8   : > { %p25_p1 = scmp.eq.s32.totalorder %s24_s23, 0  ;;  %p35_p2 = scmp.eq.s32.totalorder %s2127_s18, 0 }
   0x9   : > { %p40_p3 = scmp.ne.s32.totalorder %s2119_s16, %s2115_s15  ;;  %p41_p4 = scmp.eq.s32.totalorder %s2246_s19, 0 }
   0xa   : > { %s2262_s24 = scalar_select %p25_p1, %s2123_s17, %s27_s22  }
   0xb   : > { %p2264_p5 = por %p35_p2, %p34_p0  ;;  %p2268_p6 = por %p41_p4, %p40_p3 }
   0xc   : > { %p127_p7 = scmp.eq.s32.totalorder %s2246_s19, 1  ;;  %p133_p8 = scmp.eq.s32.totalorder %s1804_s20, 1 }
   0xd   : > { %p1861_p10 = scmp.lt.s32.totalorder %s2127_s18, 2  ;;  %s162_s29 = sand.u32 1, %s2123_s17  }
   0xe   : > { %p2275_p11 = por %p127_p7, %p34_p0  ;;  %p2279_p12 = por %p133_p8, %p40_p3 }
   0xf   : > { %s1826_s30 = sshll.u32 %s2127_s18, 9  ;;  %s1807_s5 = sshll.u32 %s162_s29, 5 }
  0x10   : > { %s3476_s27 = scalar_select %p2275_p11, 1, 0 }
  0x11   : > { %s3477_s28 = scalar_select %p2279_p12, 1, 0 }
  0x12   : > { %s2288_s8 = scalar_lea.hbm %s3446_s0, %s1826_s30  ;;  %s166_s9 = scalar_lea.vmem [#allocation2], %s1807_s5 }
  0x13   : > { %s173_s10 = sshll.u32 %s166_s9, 4  ;;  %p2292_p13 = pnand %p1861_p10, %p2264_p5  ;;  %s2296_s10 = int_to_ptr.vmem [resolvable:$true] %s173_s10 }
  0x14   : > { %s2298_s12 = scalar_lea.sflag [#allocation3], %s162_s29  ;;  %s2031_s13 = scalar_lea.hbm %s2288_s8, 512 }
  0x15   : > { %p2032_p0 = scmp.ne.s32.totalorder %s2288_s8, %s2031_s13  ;;  %p2033_p1 = pneg %p2292_p13 }
  0x16   : > { %s2036_s22 = scalar_lea.hbm %s3446_s0, 1024  ;;  %p2037_p4 = scmp.lt.u32.totalorder %s2288_s8, %s3446_s0 }
  0x17   : > { %p2034_p2 = pnand %p2033_p1, %p2032_p0  ;;  %p2038_p5 = scmp.lt.u32.totalorder %s2036_s22, %s2031_s13 }
  0x18   : > { %p2040_p8 = scmp.lt.u32.totalorder %s2031_s13, %s2288_s8 }
  0x19   : > { %p2035_p3 = pneg %p2034_p2  ;;  %p2039_p7 = por %p2038_p5, %p2037_p4 }
  0x1b   : > { %p2041_p10 = por %p2040_p8, %p2039_p7 }
  0x1d   : > { %p2042_p9 = pnand %p2041_p10, %p2035_p3 }
  0x1f   : > { %2045 = shalt.err (!%p2042_p9)
}
  0x20   : > { %s2046_s29 = scalar_lea.vmem %s2296_s10, 512  ;;  %s2129_s30 = smov [#allocation2]  }
  0x21   : > { %p2047_p0 = scmp.ne.s32.totalorder %s2296_s10, %s2046_s29  ;;  %s2051_s5 = sshll.u32 %s2129_s30, 4  ;;  %s2052_s5 = int_to_ptr.vmem [resolvable:$false] %s2051_s5 }
  0x22   : > { %s2053_s6 = scalar_lea.vmem %s2052_s5, 1024  ;;  %p2054_p11 = scmp.lt.s32.totalorder %s2296_s10, %s2052_s5 }
  0x23   : > { %p2049_p2 = pnand %p2047_p0, %p2033_p1  ;;  %p2055_p4 = scmp.lt.s32.totalorder %s2053_s6, %s2046_s29 }
  0x25   : > { %p2050_p12 = pneg %p2049_p2  ;;  %p2056_p5 = por %p2055_p4, %p2054_p11 }
  0x27   : > { %p2057_p7 = pnand %p2056_p5, %p2050_p12 }
  0x29   : > { %2060 = shalt.err (!%p2057_p7)
}
  0x2a   : > { %s2130_s7 = smov 256   ;;  %s2131_s9 = smov 16  }
  0x2b   : > { %1856 = dma.hbm_to_vmem [thread:$0]  (!%p2292_p13), %s2288_s8, 512, %s2296_s10, %s2298_s12, %s2130_s7, %s2130_s7, %s2131_s9  }
  0x2c   : > { %p1810_p9 = scmp.ge.s32.totalorder %s2127_s18, 1  ;;  %p181_p1 = scmp.lt.s32.totalorder %s2127_s18, 3 }
  0x2e   : > { %p182_p3 = pnand %p1810_p9, %p181_p1 }
  0x30   : > { %185 = sbr.rel (%p182_p3) target bundleno = 1606 (0x646), region = 36 }
  0x37   : > { %s2329_s13 = sand.u32 1, %s2119_s16  }
  0x38   : > { %s1811_s14 = sshll.u32 %s2329_s13, 5  ;;  %s188_s20 = scalar_lea.sflag [#allocation3], %s2329_s13 }
  0x39   : > { %s191_s22 = scalar_lea.vmem [#allocation2], %s1811_s14 }
  0x3a   : > { %2106 = dma.done.wait (%p2268_p6), %s188_s20, 512  }
  0x3b   : > { %2108 = vsyncadd (%p2268_p6), %s188_s20, 4294966784  ;;  %v2339_v0 = vld [vmem:[%s191_s22] sm:$0xff]  ;;  %v2341_v1 = vld [vmem:[%s191_s22 + $0x8] sm:$0xff]  ;;  %v2132_v8 = vmov 0.0|0.0   ;;  %vm2133_vm0 = vmmov 0   ;;  %v2134_v9 = vmov 0.0  }
  0x3c   : > { %v2343_v2 = vld [vmem:[%s191_s22 + $0x10] sm:$0xff]  ;;  %v220_v3 = vadd.f32 %v2341_v1, %v2339_v0  ;;  %v228_v4 = vmax.f32 %v2339_v0, %v2341_v1  ;;  %v2349_v5 = vld [vmem:[%s191_s22 + $0x18] sm:$0xff]  ;;  %1846 = vmatprep.subr.bf16.mxu0 %v2132_v8  ;;  %1838 = vmatprep.mubr.msk.f32.mxu0 %vm2133_vm0, %v2134_v9  ;;  %vm234_vm1 = vcmask 7168   ;;  %v237_v19 = vld [vmem:[%s3447_s1] sm:$0x3]  ;;  %vm238_vm2 = vcmask 130048  }
  0x3d   : > { %v223_v6 = vadd.f32 %v2349_v5, %v2343_v2  ;;  %v231_v7 = vmax.f32 %v2343_v2, %v2349_v5  ;;  %v313_v20 = vld [vmem:[%s3448_s2] sm:$0xff]  ;;  %vm315_vm3 = vcmask 15360   ;;  %v2135_v22 = vmov 7   ;;  %s2182_s30 = smov 127   ;;  %s2185_s5 = smov 51  }
  0x3e   : > { %221 = vadd.xlane.f32.xlu0 %v220_v3  ;;  %229 = vmax.xlane.f32.xlu1 %v228_v4  ;;  %v2365_v21 = vld [vmem:[%s3449_s3] sm:$0x3]  ;;  %v2136_v23 = vmov 0   ;;  %v2137_v24 = vmov 21   ;;  %v2138_v25 = vmov 14   ;;  %v2139_v26 = vmov 28  }
  0x3f   : > { %1843 = vmatprep.mubr.msk.f32.mxu1 %vm315_vm3, %v313_v20  ;;  %1965 = vset.pattern.permute.xlu1 %v2135_v22  ;;  %v2140_v27 = vmov 8   ;;  %v2141_v28 = vmov 35   ;;  %v2142_v29 = vmov 2   ;;  %v2143_v30 = vmov 42   ;;  %s2186_s6 = smov 112   ;;  %s2187_s7 = smov 96  }
  0x40   : > { %1964 = vset.pattern.permute.xlu0 %v2136_v23  ;;  %v2144_v31 = vmov 16   ;;  %v2145_v32 = vmov 1   ;;  %v2146_v33 = vmov 3   ;;  %v2147_v34 = vmov 15   ;;  %s2188_s9 = smov 80   ;;  %s2189_s20 = smov 64  }
  0x41   : > { %v2148_v35 = vmov 17   ;;  %v2149_v36 = vmov 22   ;;  %v2150_v37 = vmov 11   ;;  %v2151_v38 = vmov 29   ;;  %s2190_s22 = smov 48   ;;  %s2191_s26 = smov 32  }
  0x42   : > { %224 = vadd.xlane.f32.xlu0 %v223_v6  ;;  %232 = vmax.xlane.f32.xlu1 %v231_v7  ;;  %v2152_v39 = vmov 25   ;;  %v2153_v40 = vmov 36   ;;  %v2154_v41 = vmov 32   ;;  %v2155_v42 = vmov 43   ;;  %v314_v6 = vld [vmem:[%s3448_s2 + $0x8] sm:$0xff]  ;;  %s2192_s8 = smov 126  }
  0x43   : > { %v2156_v43 = vmov 38   ;;  %v2157_v44 = vmov 9   ;;  %v2158_v45 = vmov 27   ;;  %v2159_v46 = vmov 23   ;;  %s2193_s10 = smov 125   ;;  %s2194_s11 = smov 123  }
  0x44   : > { %v2160_v47 = vmov 40   ;;  %v2161_v48 = vmov 30   ;;  %v2162_v49 = vmov 41   ;;  %v2163_v50 = vmov 37   ;;  %s2195_s12 = smov 124   ;;  %s2196_s23 = smov 122  }
  0x45   : > { %v2164_v51 = vmov 5   ;;  %v2165_v52 = vmov 44   ;;  %v2166_v53 = vmov 48   ;;  %v2167_v54 = vmov 10   ;;  %s1827_s25 = sshll.u32 %s2246_s19, 9  ;;  %s215_s29 = scalar_lea.vmem [#allocation5], %s1811_s14 }
  0x46   : > { %v2168_v55 = vmov 24   ;;  %v2169_v56 = vmov 31   ;;  %v2170_v57 = vmov 18   ;;  %v2171_v58 = vmov 12   ;;  %s1718_s19 = scalar_lea.sflag [#allocation4], %s2329_s13  ;;  %p3545_p11 = scmp.ne.s32.totalorder %s3476_s27, 0 }
  0x47   : > { %v2172_v59 = vmov 19   ;;  %v2173_v60 = vmov 13   ;;  %v2174_v61 = vmov 26   ;;  %v2175_v62 = vmov 20  }
  0x48   : > { %vm322_vm4 = vcmask 1041408   ;;  %v2176_v7 = vmov 39   ;;  %v2177_v8 = vmov 33   ;;  %v2178_v9 = vmov 45  }
  0x49   : > { %vm475_vm5 = vcmask 1040384   ;;  %vm484_vm6 = vcmask 416768   ;;  %vm531_vm7 = vcmask 916480   ;;  %vm554_vm8 = vcmask 785408  }
  0x4a   : > { %vm577_vm9 = vcmask 654336   ;;  %vm600_vm10 = vcmask 523264   ;;  %vm623_vm11 = vcmask 392192   ;;  %vm646_vm12 = vcmask 261120  }
  0x4b   : > { %vm821_vm13 = vcmask 1039360   ;;  %vm992_vm15 = vcmask 1031168  }
  0x53   : > { %516 = vperm.xlu1 %1965, %v2365_v21  }
  0x57   : > { %1967 = vset.pattern.permute.xlu1 %v2137_v24 }
  0x58   : > { %510 = vperm.xlu0 %1964, %v2365_v21   ;;  %562 = vperm.xlu1 %1967, %v2365_v21  }
  0x5c   : > { %1966 = vset.pattern.permute.xlu0 %v2138_v25  ;;  %1968 = vset.pattern.permute.xlu1 %v2139_v26 }
  0x5d   : > { %539 = vperm.xlu0 %1966, %v2365_v21   ;;  %585 = vperm.xlu1 %1968, %v2365_v21  }
  0x61   : > { %1972 = vset.pattern.permute.xlu0 %v2140_v27  ;;  %1969 = vset.pattern.permute.xlu1 %v2141_v28 }
  0x62   : > { %667 = vperm.xlu0 %1972, %v2365_v21   ;;  %608 = vperm.xlu1 %1969, %v2365_v21  }
  0x66   : > { %1978 = vset.pattern.permute.xlu0 %v2142_v29  ;;  %1970 = vset.pattern.permute.xlu1 %v2143_v30 }
  0x67   : > { %831 = vperm.xlu0 %1978, %v2365_v21   ;;  %631 = vperm.xlu1 %1970, %v2365_v21  }
  0x6b   : > { %1980 = vset.pattern.permute.xlu0 %v2144_v31  ;;  %1971 = vset.pattern.permute.xlu1 %v2145_v32  ;;  %v2183_v31 = vmov 4  }
  0x6c   : > { %862 = vperm.xlu0 %1980, %v2365_v21   ;;  %660 = vperm.xlu1 %1971, %v2365_v21  }
  0x70   : > { %1985 = vset.pattern.permute.xlu0 %v2146_v33  ;;  %1973 = vset.pattern.permute.xlu1 %v2147_v34  ;;  %v2184_v33 = vmov 6  }
  0x71   : > { %1002 = vperm.xlu0 %1985, %v2365_v21   ;;  %691 = vperm.xlu1 %1973, %v2365_v21  }
  0x75   : > { %1987 = vset.pattern.permute.xlu0 %v2148_v35  ;;  %1974 = vset.pattern.permute.xlu1 %v2149_v36 }
  0x76   : > { %1033 = vperm.xlu0 %1987, %v2365_v21   ;;  %715 = vperm.xlu1 %1974, %v2365_v21  }
  0x7a   : > { %1990 = vset.pattern.permute.xlu0 %v2150_v37  ;;  %1975 = vset.pattern.permute.xlu1 %v2151_v38 }
  0x7b   : > { %1176 = vperm.xlu0 %1990, %v2365_v21   ;;  %739 = vperm.xlu1 %1975, %v2365_v21  }
  0x7f   : > { %1993 = vset.pattern.permute.xlu0 %v2152_v39  ;;  %1976 = vset.pattern.permute.xlu1 %v2153_v40 }
  0x80   : > { %1224 = vperm.xlu0 %1993, %v2365_v21   ;;  %763 = vperm.xlu1 %1976, %v2365_v21  }
  0x84   : > { %1996 = vset.pattern.permute.xlu0 %v2154_v41  ;;  %1977 = vset.pattern.permute.xlu1 %v2155_v42 }
  0x85   : > { %1248 = vperm.xlu0 %1996, %v2365_v21   ;;  %787 = vperm.xlu1 %1977, %v2365_v21  }
  0x89   : > { %1999 = vset.pattern.permute.xlu0 %v2156_v43  ;;  %1979 = vset.pattern.permute.xlu1 %v2157_v44 }
  0x8a   : > { %1105 = vperm.xlu0 %1999, %v2365_v21   ;;  %838 = vperm.xlu1 %1979, %v2365_v21  }
  0x8e   : > { %2002 = vset.pattern.permute.xlu0 %v2158_v45  ;;  %1981 = vset.pattern.permute.xlu1 %v2159_v46 }
  0x8f   : > { %1566 = vperm.xlu0 %2002, %v2365_v21   ;;  %886 = vperm.xlu1 %1981, %v2365_v21  }
  0x93   : > { %2005 = vset.pattern.permute.xlu0 %v2160_v47  ;;  %1982 = vset.pattern.permute.xlu1 %v2161_v48 }
  0x94   : > { %1443 = vperm.xlu0 %2005, %v2365_v21   ;;  %910 = vperm.xlu1 %1982, %v2365_v21  }
  0x98   : > { %2008 = vset.pattern.permute.xlu0 %v2162_v49  ;;  %1983 = vset.pattern.permute.xlu1 %v2163_v50 }
  0x99   : > { %1614 = vperm.xlu0 %2008, %v2365_v21   ;;  %934 = vperm.xlu1 %1983, %v2365_v21  }
  0x9d   : > { %2011 = vset.pattern.permute.xlu0 %v2164_v51  ;;  %1984 = vset.pattern.permute.xlu1 %v2165_v52 }
  0x9e   : > { %1340 = vperm.xlu0 %2011, %v2365_v21   ;;  %958 = vperm.xlu1 %1984, %v2365_v21  }
  0xa2   : > { %2014 = vset.pattern.permute.xlu0 %v2166_v53  ;;  %1986 = vset.pattern.permute.xlu1 %v2167_v54 }
  0xa3   : > { %1009 = vperm.xlu1 %1986, %v2365_v21  }
  0xa7   : > { %1988 = vset.pattern.permute.xlu1 %v2168_v55 }
  0xa8   : > { %1057 = vperm.xlu1 %1988, %v2365_v21  }
  0xac   : > { %1989 = vset.pattern.permute.xlu1 %v2169_v56 }
  0xad   : > { %1081 = vperm.xlu1 %1989, %v2365_v21  }
  0xb1   : > { %1991 = vset.pattern.permute.xlu1 %v2170_v57 }
  0xb2   : > { %1200 = vperm.xlu1 %1991, %v2365_v21  }
  0xb6   : > { %1992 = vset.pattern.permute.xlu1 %v2171_v58 }
  0xb7   : > { %1347 = vperm.xlu1 %1992, %v2365_v21  }
  0xbb   : > { %1994 = vset.pattern.permute.xlu1 %v2172_v59 }
  0xbc   : > { %1371 = vperm.xlu1 %1994, %v2365_v21  }
  0xc0   : > { %1995 = vset.pattern.permute.xlu1 %v2173_v60 }
  0xc1   : > { %1518 = vperm.xlu1 %1995, %v2365_v21  }
  0xc5   : > { %1997 = vset.pattern.permute.xlu1 %v2174_v61 }
  0xc6   : > { %1395 = vperm.xlu1 %1997, %v2365_v21  }
  0xca   : > { %1998 = vset.pattern.permute.xlu1 %v2175_v62 }
  0xcb   : > { %v222_v10 = vpop.xlane.xlu0 %221  ;;  %v230_v11 = vpop.xlane.xlu1 %229  ;;  %1542 = vperm.xlu1 %1998, %v2365_v21  }
  0xcc   : > { %v226_v12 = vmul.f32 0.00390625, %v222_v10  ;;  %v2179_v10 = vmov 46  }
  0xce   : > { %v235_v16 = vsel %vm234_vm1, %v226_v12, %v230_v11  ;;  %v2180_v11 = vmov 34   ;;  %v2181_v12 = vmov 47  }
  0xcf   : > { %v225_v13 = vpop.xlane.xlu0 %224  ;;  %v233_v14 = vpop.xlane.xlu1 %232  ;;  %2000 = vset.pattern.permute.xlu1 %v2176_v7 }
  0xd0   : > { %v227_v15 = vmul.f32 0.00390625, %v225_v13  ;;  %1272 = vperm.xlu1 %2000, %v2365_v21  }
  0xd2   : > { %v236_v17 = vsel %vm234_vm1, %v227_v15, %v233_v14 }
  0xd3   : > { %v1847_v18 = vpack.c.bf16 %v236_v17, %v235_v16  ;;  %v2419_v13 = vpop.permute.xlu1 %516 }
  0xd4   : > { %2001 = vset.pattern.permute.xlu1 %v2177_v8 }
  0xd5   : > { %1848 = vmatpush3.bf16.msra.mxu0 %v1847_v18  ;;  %1419 = vperm.xlu1 %2001, %v2365_v21  }
  0xd7   : > { %v2421_v14 = vpop.permute.xlu1 %562  ;;  %v2460_v37 = vpop.permute.xlu0 %510 }
  0xd8   : > { %1839 = vmatmul.mubr.msk.f32.vlgmr.msra.gmra.mrb[0].mxu0 %vm238_vm2, %v237_v19  ;;  %3480 = vst [vmem:[#allocation9_spill] sm:$0xff] %v2460_v37 }
  0xd9   : > { %2003 = vset.pattern.permute.xlu1 %v2178_v9 }
  0xda   : > { %1129 = vperm.xlu1 %2003, %v2365_v21  }
  0xdc   : > { %v2423_v15 = vpop.permute.xlu1 %585  ;;  %v2464_v39 = vpop.permute.xlu0 %539 }
  0xde   : > { %2004 = vset.pattern.permute.xlu1 %v2179_v10 }
  0xdf   : > { %1296 = vperm.xlu1 %2004, %v2365_v21  }
  0xe1   : > { %v2425_v16 = vpop.permute.xlu1 %608  ;;  %v2468_v41 = vpop.permute.xlu0 %667 }
  0xe3   : > { %2006 = vset.pattern.permute.xlu1 %v2180_v11 }
  0xe4   : > { %1590 = vperm.xlu1 %2006, %v2365_v21  }
  0xe6   : > { %v2427_v17 = vpop.permute.xlu1 %631 }
  0xe8   : > { %2007 = vset.pattern.permute.xlu1 %v2181_v12 }
  0xe9   : > { %1467 = vperm.xlu1 %2007, %v2365_v21  }
  0xeb   : > { %v2429_v18 = vpop.permute.xlu1 %660 }
  0xec   : > { %3479 = vst [vmem:[#allocation8_spill] sm:$0xff] %v2429_v18 }
  0xed   : > { %2009 = vset.pattern.permute.xlu1 %v2166_v53 }
  0xee   : > { %1638 = vperm.xlu1 %2009, %v2365_v21  }
  0xf0   : > { %v2431_v19 = vpop.permute.xlu1 %691 }
  0xf2   : > { %2010 = vset.pattern.permute.xlu1 %v2183_v31 }
  0xf5   : > { %v2433_v20 = vpop.permute.xlu1 %715 }
  0xfa   : > { %v2435_v22 = vpop.permute.xlu1 %739 }
  0xff   : > { %v2437_v24 = vpop.permute.xlu1 %763 }
 0x104   : > { %v2439_v25 = vpop.permute.xlu1 %787 }
 0x109   : > { %v2441_v26 = vpop.permute.xlu1 %838 }
 0x10e   : > { %v2443_v27 = vpop.permute.xlu1 %886 }
 0x113   : > { %v2446_v30 = vpop.permute.xlu1 %910 }
 0x118   : > { %v2450_v32 = vpop.permute.xlu1 %934 }
 0x11d   : > { %v2453_v34 = vpop.permute.xlu1 %958 }
 0x122   : > { %v2456_v35 = vpop.permute.xlu1 %1009 }
 0x127   : > { %v2458_v36 = vpop.permute.xlu1 %1057 }
 0x12c   : > { %v2462_v38 = vpop.permute.xlu1 %1081 }
 0x131   : > { %v2466_v40 = vpop.permute.xlu1 %1200 }
 0x136   : > { %v2470_v42 = vpop.permute.xlu1 %1347 }
 0x13b   : > { %v2474_v43 = vpop.permute.xlu1 %1371 }
 0x140   : > { %v2478_v44 = vpop.permute.xlu1 %1518 }
 0x145   : > { %v2482_v46 = vpop.permute.xlu1 %1395 }
 0x14a   : > { %v2486_v48 = vpop.permute.xlu1 %1542 }
 0x14f   : > { %v2490_v50 = vpop.permute.xlu1 %1272 }
 0x154   : > { %v2494_v52 = vpop.permute.xlu1 %1419 }
 0x159   : > { %v2498_v54 = vpop.permute.xlu1 %1129 }
 0x15e   : > { %v2502_v56 = vpop.permute.xlu1 %1296 }
 0x163   : > { %v2506_v58 = vpop.permute.xlu1 %1590 }
 0x164   : > { %3483 = vst [vmem:[#allocation12_spill] sm:$0xff] %v2506_v58 }
 0x168   : > { %v2510_v60 = vpop.permute.xlu1 %1467 }
 0x169   : > { %3485 = vst [vmem:[#allocation14_spill] sm:$0xff] %v2510_v60 }
 0x16d   : > { %v2514_v62 = vpop.permute.xlu1 %1638 }
 0x16e   : > { %3487 = vst [vmem:[#allocation16_spill] sm:$0xff] %v2514_v62 }
 0x1ab   : > { %v308_v63 = vpop.f32.mrb[0].mxu0 }
 0x1ac   : > { %v312_v3 = vmax.f32 %v308_v63, 0.0  ;;  %v1840_v4 = vpop.f32.mrb[1].mxu0 }
 0x1ae   : > { %1841 = vmatprep.subr.msk.mxu1 %vm322_vm4, %v312_v3 }
 0x1af   : > { %1842 = vmatpush3.msk.msra.mxu1 %vm322_vm4, %v312_v3 }
 0x1b0   : > { %1844 = vmatmul.mubr.msk.f32.vlgmr.msra.gmra.mrb[0].mxu1 %vm315_vm3, %v314_v6 }
 0x283   : > { %v1845_v28 = vpop.f32.mrb[0].mxu1 }
 0x284   : > { %405 = vrot.lane.b32.xlu1 %v1845_v28, %s2182_s30  ;;  %v392_v29 = vpop.f32.mrb[1].mxu1 }
 0x285   : > { %403 = vrot.lane.b32.xlu0 %v392_v29, %s2182_s30 }
 0x288   : > { %1169 = vperm.xlu1 %2010, %v2365_v21  }
 0x28c   : > { %2012 = vset.pattern.permute.xlu1 %v2184_v33 }
 0x28d   : > { %1511 = vperm.xlu1 %2012, %v2365_v21   ;;  %v2472_v21 = vpop.permute.xlu0 %831 }
 0x28e   : > { %3481 = vst [vmem:[#allocation10_spill] sm:$0xff] %v2472_v21 }
 0x291   : > { %2013 = vset.pattern.permute.xlu1 %v2136_v23  ;;  %v2476_v23 = vpop.permute.xlu0 %862 }
 0x295   : > { %v2480_v45 = vpop.permute.xlu0 %1002 }
 0x296   : > { %3482 = vst [vmem:[#allocation11_spill] sm:$0xff] %v2480_v45 }
 0x299   : > { %v2484_v47 = vpop.permute.xlu0 %1033 }
 0x29d   : > { %v2488_v49 = vpop.permute.xlu0 %1176 }
 0x2a1   : > { %v2492_v51 = vpop.permute.xlu0 %1224 }
 0x2a5   : > { %v2496_v53 = vpop.permute.xlu0 %1248 }
 0x2a9   : > { %v2500_v55 = vpop.permute.xlu0 %1105 }
 0x2ad   : > { %v2504_v57 = vpop.permute.xlu0 %1566 }
 0x2b1   : > { %v2508_v59 = vpop.permute.xlu0 %1443 }
 0x2b2   : > { %3484 = vst [vmem:[#allocation13_spill] sm:$0xff] %v2508_v59 }
 0x2b5   : > { %v2512_v61 = vpop.permute.xlu0 %1614 }
 0x2b6   : > { %3486 = vst [vmem:[#allocation15_spill] sm:$0xff] %v2512_v61 }
 0x2b9   : > { %v2516_v63 = vpop.permute.xlu0 %1340 }
 0x2ba   : > { %3488 = vst [vmem:[#allocation17_spill] sm:$0xff] %v2516_v63 }
 0x2f6   : > { %v406_v3 = vpop.permute.xlu1 %405 }
 0x2f7   : > { %v410_v4 = vadd.f32 %v1845_v28, %v406_v3  ;;  %v404_v6 = vpop.permute.xlu0 %403 }
 0x2f8   : > { %v409_v7 = vadd.f32 %v404_v6, %v392_v29 }
 0x2f9   : > { %v1818_v8 = vmul.f32 -1.442695, %v410_v4 }
 0x2fa   : > { %v1817_v9 = vmul.f32 -1.442695, %v409_v7 }
 0x2fb   : > { %2015 = vpow2.f32 %v1818_v8 }
 0x2fc   : > { %2017 = vpow2.f32 %v1817_v9 }
 0x305   : > { %v2016_v10 = vpop.eup %2015 }
 0x306   : > { %v2018_v11 = vpop.eup %2017  ;;  %v418_v12 = vadd.f32 1.0, %v2016_v10 }
 0x307   : > { %v417_v31 = vadd.f32 1.0, %v2018_v11  ;;  %v2518_v62 = vpop.permute.xlu1 %1169 }
 0x308   : > { %2019 = vrcp.f32 %v418_v12  ;;  %3489 = vst [vmem:[#allocation18_spill] sm:$0xff] %v2518_v62 }
 0x309   : > { %2021 = vrcp.f32 %v417_v31 }
 0x30c   : > { %v2520_v63 = vpop.permute.xlu1 %1511 }
 0x30d   : > { %3490 = vst [vmem:[#allocation19_spill] sm:$0xff] %v2520_v63 }
 0x312   : > { %v2020_v33 = vpop.eup %2019 }
 0x313   : > { %430 = vperm.xlu1 %2013, %v2020_v33   ;;  %v2022_v37 = vpop.eup %2021 }
 0x317   : > { %425 = vperm.xlu1 %2013, %v2022_v37  }
 0x392   : > { %v431_v28 = vpop.permute.xlu1 %430 }
 0x393   : > { %v2523_v3 = vmul.f32 %v431_v28, %v2343_v2  ;;  %v2526_v4 = vmul.f32 %v431_v28, %v2349_v5 }
 0x395   : > { %3491 = vst [vmem:[#allocation20_spill] sm:$0xff] %v2523_v3  ;;  %3492 = vst [vmem:[#allocation21_spill] sm:$0xff] %v2526_v4 }
 0x396   : > { %v426_v29 = vpop.permute.xlu1 %425 }
 0x397   : > { %v2529_v6 = vmul.f32 %v426_v29, %v2339_v0  ;;  %v2532_v7 = vmul.f32 %v426_v29, %v2341_v1 }
 0x399   : > { %3493 = vst [vmem:[#allocation22_spill] sm:$0xff] %v2529_v6  ;;  %3494 = vst [vmem:[#allocation23_spill] sm:$0xff] %v2532_v7  ;;  %v452_v37 = vadd.f32 %v2526_v4, %v2532_v7  ;;  %v468_v8 = vmax.f32 %v2532_v7, %v2526_v4  ;;  %v445_v9 = vadd.f32 %v2523_v3, %v2529_v6 }
 0x39a   : > { %v461_v2 = vmax.f32 %v2529_v6, %v2523_v3 }
 0x39b   : > { %v453_v5 = vrot.slane %v452_v37, 4  ;;  %v469_v10 = vrot.slane %v468_v8, 4  ;;  %v446_v11 = vrot.slane %v445_v9, 4 }
 0x39c   : > { %v462_v0 = vrot.slane %v461_v2, 4 }
 0x39d   : > { %v454_v12 = vadd.f32 %v453_v5, %v452_v37  ;;  %v470_v31 = vmax.f32 %v468_v8, %v469_v10  ;;  %v447_v1 = vadd.f32 %v446_v11, %v445_v9 }
 0x39e   : > { %v463_v33 = vmax.f32 %v461_v2, %v462_v0 }
 0x39f   : > { %v455_v28 = vrot.slane %v454_v12, 2  ;;  %v471_v29 = vrot.slane %v470_v31, 2  ;;  %v448_v63 = vrot.slane %v447_v1, 2 }
 0x3a0   : > { %v464_v62 = vrot.slane %v463_v33, 2 }
 0x3a1   : > { %v456_v18 = vadd.f32 %v455_v28, %v454_v12  ;;  %v472_v4 = vmax.f32 %v470_v31, %v471_v29  ;;  %v449_v7 = vadd.f32 %v448_v63, %v447_v1 }
 0x3a2   : > { %v465_v61 = vmax.f32 %v463_v33, %v464_v62 }
 0x3a3   : > { %v457_v60 = vrot.slane %v456_v18, 1  ;;  %v473_v58 = vrot.slane %v472_v4, 1  ;;  %v450_v45 = vrot.slane %v449_v7, 1 }
 0x3a4   : > { %v466_v3 = vrot.slane %v465_v61, 1 }
 0x3a5   : > { %v458_v6 = vadd.f32 %v457_v60, %v456_v18  ;;  %v451_v59 = vadd.f32 %v450_v45, %v449_v7  ;;  %v474_v37 = vmax.f32 %v472_v4, %v473_v58 }
 0x3a6   : > { %v467_v9 = vmax.f32 %v465_v61, %v466_v3 }
 0x3a7   : > { %v460_v21 = vmul.f32 0.0625, %v458_v6  ;;  %v459_v8 = vmul.f32 0.0625, %v451_v59 }
 0x3a9   : > { %v477_v2 = vsel %vm475_vm5, %v460_v21, %v474_v37  ;;  %v476_v5 = vsel %vm475_vm5, %v459_v8, %v467_v9  ;;  %vm1161_vm5 = vcmask 1022976  }
 0x3aa   : > { %482 = vrot.lane.b32.xlu1 %v477_v2, %s2185_s5  ;;  %480 = vrot.lane.b32.xlu0 %v476_v5, %s2185_s5 }
 0x41c   : > { %v483_v10 = vpop.permute.xlu1 %482  ;;  %v481_v63 = vpop.permute.xlu0 %480 }
 0x41d   : > { %v2542_v62 = vsel %vm484_vm6, %v481_v63, %v483_v10  ;;  %v2544_v11 = vsel %vm484_vm6, 0.0, %v481_v63  ;;  %v2550_v58 = vsel %vm484_vm6, %v483_v10, 0.0  ;;  %vm1330_vm6 = vcmask 1014784  }
 0x41e   : > { %3495 = vst [vmem:[#allocation24_spill] sm:$0xff] %v2542_v62  ;;  %v519_v18 = vmul.f32 %v2419_v13, %v2544_v11  ;;  %v520_v45 = vmul.f32 %v2419_v13, %v2542_v62  ;;  %v521_v21 = vmul.f32 %v2419_v13, %v2550_v58  ;;  %v544_v59 = vmul.f32 %v2464_v39, %v2550_v58 }
 0x41f   : > { %v542_v60 = vmul.f32 %v2464_v39, %v2544_v11  ;;  %v565_v61 = vmul.f32 %v2421_v14, %v2544_v11  ;;  %v543_v13 = vmul.f32 %v2464_v39, %v2542_v62  ;;  %v567_v3 = vmul.f32 %v2421_v14, %v2550_v58 }
 0x420   : > { %525 = vrot.lane.b32.xlu1 %v519_v18, %s2186_s6  ;;  %527 = vrot.lane.b32.xlu0 %v520_v45, %s2186_s6  ;;  %v566_v4 = vmul.f32 %v2421_v14, %v2542_v62  ;;  %v588_v6 = vmul.f32 %v2423_v15, %v2544_v11  ;;  %v589_v39 = vmul.f32 %v2423_v15, %v2542_v62 }
 0x421   : > { %v590_v7 = vmul.f32 %v2423_v15, %v2550_v58  ;;  %v612_v14 = vmul.f32 %v2425_v16, %v2542_v62  ;;  %v611_v0 = vmul.f32 %v2425_v16, %v2544_v11  ;;  %v635_v12 = vmul.f32 %v2427_v17, %v2542_v62 }
 0x422   : > { %v613_v15 = vmul.f32 %v2425_v16, %v2550_v58  ;;  %v670_v31 = vmul.f32 %v2468_v41, %v2544_v11  ;;  %v634_v1 = vmul.f32 %v2427_v17, %v2544_v11  ;;  %v671_v33 = vmul.f32 %v2468_v41, %v2542_v62 }
 0x423   : > { %v636_v16 = vmul.f32 %v2427_v17, %v2550_v58  ;;  %v695_v28 = vmul.f32 %v2431_v19, %v2542_v62  ;;  %v672_v29 = vmul.f32 %v2468_v41, %v2550_v58  ;;  %v719_v37 = vmul.f32 %v2433_v20, %v2542_v62 }
 0x424   : > { %529 = vrot.lane.b32.xlu1 %v521_v21, %s2186_s6  ;;  %552 = vrot.lane.b32.xlu0 %v544_v59, %s2187_s7  ;;  %v694_v17 = vmul.f32 %v2431_v19, %v2544_v11  ;;  %v743_v8 = vmul.f32 %v2435_v22, %v2542_v62  ;;  %v696_v41 = vmul.f32 %v2431_v19, %v2550_v58 }
 0x425   : > { %v767_v9 = vmul.f32 %v2437_v24, %v2542_v62  ;;  %v718_v2 = vmul.f32 %v2433_v20, %v2544_v11  ;;  %v791_v5 = vmul.f32 %v2439_v25, %v2542_v62  ;;  %v720_v19 = vmul.f32 %v2433_v20, %v2550_v58 }
 0x426   : > { %v841_v10 = vmul.f32 %v2441_v26, %v2544_v11  ;;  %v742_v63 = vmul.f32 %v2435_v22, %v2544_v11  ;;  %v843_v18 = vmul.f32 %v2441_v26, %v2550_v58  ;;  %v744_v20 = vmul.f32 %v2435_v22, %v2550_v58 }
 0x427   : > { %v865_v45 = vmul.f32 %v2476_v23, %v2544_v11  ;;  %v766_v21 = vmul.f32 %v2437_v24, %v2544_v11  ;;  %v866_v59 = vmul.f32 %v2476_v23, %v2542_v62  ;;  %v768_v22 = vmul.f32 %v2437_v24, %v2550_v58 }
 0x428   : > { %548 = vrot.lane.b32.xlu1 %v542_v60, %s2187_s7  ;;  %571 = vrot.lane.b32.xlu0 %v565_v61, %s2188_s9  ;;  %v890_v60 = vmul.f32 %v2443_v27, %v2542_v62  ;;  %v790_v61 = vmul.f32 %v2439_v25, %v2544_v11  ;;  %v792_v24 = vmul.f32 %v2439_v25, %v2550_v58 }
 0x429   : > { %v867_v25 = vmul.f32 %v2476_v23, %v2550_v58  ;;  %v891_v23 = vmul.f32 %v2443_v27, %v2550_v58 }
 0x42c   : > { %550 = vrot.lane.b32.xlu1 %v543_v13, %s2187_s7  ;;  %575 = vrot.lane.b32.xlu0 %v567_v3, %s2188_s9  ;;  %v914_v13 = vmul.f32 %v2446_v30, %v2542_v62  ;;  %v938_v3 = vmul.f32 %v2450_v32, %v2542_v62 }
 0x430   : > { %573 = vrot.lane.b32.xlu1 %v566_v4, %s2188_s9  ;;  %594 = vrot.lane.b32.xlu0 %v588_v6, %s2189_s20  ;;  %v842_v4 = vmul.f32 %v2441_v26, %v2542_v62  ;;  %v962_v6 = vmul.f32 %v2453_v34, %v2542_v62  ;;  %v889_v26 = vmul.f32 %v2443_v27, %v2544_v11 }
 0x431   : > { %v915_v27 = vmul.f32 %v2446_v30, %v2550_v58 }
 0x434   : > { %596 = vrot.lane.b32.xlu1 %v589_v39, %s2189_s20  ;;  %598 = vrot.lane.b32.xlu0 %v590_v7, %s2189_s20  ;;  %v1012_v39 = vmul.f32 %v2456_v35, %v2544_v11  ;;  %v1014_v7 = vmul.f32 %v2456_v35, %v2550_v58 }
 0x438   : > { %619 = vrot.lane.b32.xlu1 %v612_v14, %s2190_s22  ;;  %617 = vrot.lane.b32.xlu0 %v611_v0, %s2190_s22  ;;  %v1036_v14 = vmul.f32 %v2484_v47, %v2544_v11  ;;  %v913_v0 = vmul.f32 %v2446_v30, %v2544_v11  ;;  %v939_v30 = vmul.f32 %v2450_v32, %v2550_v58 }
 0x43c   : > { %642 = vrot.lane.b32.xlu1 %v635_v12, %s2191_s26  ;;  %621 = vrot.lane.b32.xlu0 %v613_v15, %s2190_s22  ;;  %v1037_v12 = vmul.f32 %v2484_v47, %v2542_v62  ;;  %v1061_v15 = vmul.f32 %v2458_v36, %v2542_v62 }
 0x440   : > { %676 = vrot.lane.b32.xlu1 %v670_v31, %s2186_s6  ;;  %640 = vrot.lane.b32.xlu0 %v634_v1, %s2191_s26  ;;  %v937_v31 = vmul.f32 %v2450_v32, %v2544_v11  ;;  %v1085_v1 = vmul.f32 %v2462_v38, %v2542_v62  ;;  %v963_v32 = vmul.f32 %v2453_v34, %v2550_v58 }
 0x444   : > { %678 = vrot.lane.b32.xlu1 %v671_v33, %s2186_s6  ;;  %644 = vrot.lane.b32.xlu0 %v636_v16, %s2191_s26  ;;  %v1179_v33 = vmul.f32 %v2488_v49, %v2544_v11 }
 0x448   : > { %702 = vrot.lane.b32.xlu1 %v695_v28, %s2187_s7  ;;  %680 = vrot.lane.b32.xlu0 %v672_v29, %s2186_s6  ;;  %v961_v29 = vmul.f32 %v2453_v34, %v2544_v11 }
 0x44c   : > { %726 = vrot.lane.b32.xlu1 %v719_v37, %s2188_s9  ;;  %700 = vrot.lane.b32.xlu0 %v694_v17, %s2187_s7  ;;  %v1181_v37 = vmul.f32 %v2488_v49, %v2550_v58 }
 0x450   : > { %750 = vrot.lane.b32.xlu1 %v743_v8, %s2189_s20  ;;  %704 = vrot.lane.b32.xlu0 %v696_v41, %s2187_s7  ;;  %v1013_v41 = vmul.f32 %v2456_v35, %v2542_v62 }
 0x454   : > { %774 = vrot.lane.b32.xlu1 %v767_v9, %s2190_s22  ;;  %724 = vrot.lane.b32.xlu0 %v718_v2, %s2188_s9  ;;  %v1204_v9 = vmul.f32 %v2466_v40, %v2542_v62 }
 0x458   : > { %798 = vrot.lane.b32.xlu1 %v791_v5, %s2191_s26  ;;  %728 = vrot.lane.b32.xlu0 %v720_v19, %s2188_s9  ;;  %v1038_v5 = vmul.f32 %v2484_v47, %v2550_v58  ;;  %v1350_v19 = vmul.f32 %v2470_v42, %v2544_v11 }
 0x45c   : > { %847 = vrot.lane.b32.xlu1 %v841_v10, %s2186_s6  ;;  %748 = vrot.lane.b32.xlu0 %v742_v63, %s2189_s20  ;;  %v1352_v63 = vmul.f32 %v2470_v42, %v2550_v58 }
 0x460   : > { %851 = vrot.lane.b32.xlu1 %v843_v18, %s2186_s6  ;;  %752 = vrot.lane.b32.xlu0 %v744_v20, %s2189_s20  ;;  %v1060_v18 = vmul.f32 %v2458_v36, %v2544_v11 }
 0x464   : > { %871 = vrot.lane.b32.xlu1 %v865_v45, %s2187_s7  ;;  %772 = vrot.lane.b32.xlu0 %v766_v21, %s2190_s22  ;;  %v1062_v45 = vmul.f32 %v2458_v36, %v2550_v58  ;;  %v1228_v21 = vmul.f32 %v2492_v51, %v2542_v62 }
 0x468   : > { %873 = vrot.lane.b32.xlu1 %v866_v59, %s2187_s7  ;;  %776 = vrot.lane.b32.xlu0 %v768_v22, %s2190_s22 }
 0x46c   : > { %897 = vrot.lane.b32.xlu1 %v890_v60, %s2188_s9  ;;  %796 = vrot.lane.b32.xlu0 %v790_v61, %s2191_s26  ;;  %v1084_v60 = vmul.f32 %v2462_v38, %v2544_v11  ;;  %v1374_v61 = vmul.f32 %v2474_v43, %v2544_v11 }
 0x470   : > { %921 = vrot.lane.b32.xlu1 %v914_v13, %s2189_s20  ;;  %800 = vrot.lane.b32.xlu0 %v792_v24, %s2191_s26  ;;  %v1376_v24 = vmul.f32 %v2474_v43, %v2550_v58 }
 0x474   : > { %945 = vrot.lane.b32.xlu1 %v938_v3, %s2190_s22  ;;  %849 = vrot.lane.b32.xlu0 %v842_v4, %s2186_s6  ;;  %v1180_v3 = vmul.f32 %v2488_v49, %v2542_v62  ;;  %v1086_v49 = vmul.f32 %v2462_v38, %v2550_v58 }
 0x478   : > { %969 = vrot.lane.b32.xlu1 %v962_v6, %s2191_s26  ;;  %875 = vrot.lane.b32.xlu0 %v867_v25, %s2187_s7  ;;  %v1203_v25 = vmul.f32 %v2466_v40, %v2544_v11 }
 0x47c   : > { %1018 = vrot.lane.b32.xlu1 %v1012_v39, %s2186_s6  ;;  %895 = vrot.lane.b32.xlu0 %v889_v26, %s2188_s9  ;;  %v1522_v39 = vmul.f32 %v2478_v44, %v2542_v62 }
 0x480   : > { %1022 = vrot.lane.b32.xlu1 %v1014_v7, %s2186_s6  ;;  %899 = vrot.lane.b32.xlu0 %v891_v23, %s2188_s9  ;;  %v1205_v23 = vmul.f32 %v2466_v40, %v2550_v58  ;;  %v1227_v40 = vmul.f32 %v2492_v51, %v2544_v11 }
 0x484   : > { %1042 = vrot.lane.b32.xlu1 %v1036_v14, %s2187_s7  ;;  %919 = vrot.lane.b32.xlu0 %v913_v0, %s2189_s20 }
 0x488   : > { %1044 = vrot.lane.b32.xlu1 %v1037_v12, %s2187_s7  ;;  %923 = vrot.lane.b32.xlu0 %v915_v27, %s2189_s20  ;;  %v1252_v12 = vmul.f32 %v2496_v53, %v2542_v62  ;;  %v1351_v27 = vmul.f32 %v2470_v42, %v2542_v62  ;;  %v1229_v42 = vmul.f32 %v2492_v51, %v2550_v58 }
 0x48c   : > { %1068 = vrot.lane.b32.xlu1 %v1061_v15, %s2188_s9  ;;  %943 = vrot.lane.b32.xlu0 %v937_v31, %s2190_s22  ;;  %v1398_v31 = vmul.f32 %v2482_v46, %v2544_v11 }
 0x490   : > { %1092 = vrot.lane.b32.xlu1 %v1085_v1, %s2189_s20  ;;  %947 = vrot.lane.b32.xlu0 %v939_v30, %s2190_s22 }
 0x492   : > { %v2724_v16 = vpop.permute.xlu1 %525  ;;  %v2726_v28 = vpop.permute.xlu0 %527 }
 0x494   : > { %1185 = vrot.lane.b32.xlu1 %v1179_v33, %s2186_s6  ;;  %967 = vrot.lane.b32.xlu0 %v961_v29, %s2191_s26  ;;  %v1400_v33 = vmul.f32 %v2482_v46, %v2550_v58 }
 0x496   : > { %v2736_v17 = vpop.permute.xlu1 %529  ;;  %v2738_v8 = vpop.permute.xlu0 %552 }
 0x497   : > { %3496 = vst [vmem:[#allocation25_spill] sm:$0xff] %v2736_v17  ;;  %3497 = vst [vmem:[#allocation26_spill] sm:$0xff] %v2738_v8 }
 0x498   : > { %1189 = vrot.lane.b32.xlu1 %v1181_v37, %s2186_s6  ;;  %971 = vrot.lane.b32.xlu0 %v963_v32, %s2191_s26  ;;  %v1375_v37 = vmul.f32 %v2474_v43, %v2542_v62 }
 0x49a   : > { %v2746_v2 = vpop.permute.xlu1 %548  ;;  %v2748_v34 = vpop.permute.xlu0 %571 }
 0x49b   : > { %3498 = vst [vmem:[#allocation27_spill] sm:$0xff] %v2746_v2  ;;  %3499 = vst [vmem:[#allocation28_spill] sm:$0xff] %v2748_v34 }
 0x49c   : > { %1211 = vrot.lane.b32.xlu1 %v1204_v9, %s2187_s7  ;;  %1020 = vrot.lane.b32.xlu0 %v1013_v41, %s2186_s6  ;;  %v1546_v41 = vmul.f32 %v2486_v48, %v2542_v62 }
 0x49e   : > { %v2756_v10 = vpop.permute.xlu1 %550  ;;  %v2758_v35 = vpop.permute.xlu0 %575 }
 0x49f   : > { %3500 = vst [vmem:[#allocation29_spill] sm:$0xff] %v2756_v10  ;;  %3501 = vst [vmem:[#allocation30_spill] sm:$0xff] %v2758_v35 }
 0x4a0   : > { %1356 = vrot.lane.b32.xlu1 %v1350_v19, %s2186_s6  ;;  %1046 = vrot.lane.b32.xlu0 %v1038_v5, %s2187_s7  ;;  %v1108_v5 = vmul.f32 %v2500_v55, %v2544_v11  ;;  %v1521_v19 = vmul.f32 %v2478_v44, %v2544_v11 }
 0x4a2   : > { %v2766_v20 = vpop.permute.xlu1 %573  ;;  %v2768_v47 = vpop.permute.xlu0 %594 }
 0x4a3   : > { %3502 = vst [vmem:[#allocation31_spill] sm:$0xff] %v2766_v20  ;;  %3503 = vst [vmem:[#allocation32_spill] sm:$0xff] %v2768_v47  ;;  %v3516_v47 = vld [vmem:[#allocation14_spill] sm:$0xff] }
 0x4a4   : > { %1360 = vrot.lane.b32.xlu1 %v1352_v63, %s2186_s6  ;;  %1066 = vrot.lane.b32.xlu0 %v1060_v18, %s2188_s9  ;;  %v1110_v18 = vmul.f32 %v2500_v55, %v2550_v58 }
 0x4a6   : > { %v2776_v59 = vpop.permute.xlu1 %596  ;;  %v2778_v22 = vpop.permute.xlu0 %598 }
 0x4a7   : > { %3504 = vst [vmem:[#allocation33_spill] sm:$0xff] %v2776_v59  ;;  %3505 = vst [vmem:[#allocation34_spill] sm:$0xff] %v2778_v22  ;;  %v1569_v22 = vmul.f32 %v2504_v57, %v2544_v11 }
 0x4a8   : > { %1235 = vrot.lane.b32.xlu1 %v1228_v21, %s2188_s9  ;;  %1070 = vrot.lane.b32.xlu0 %v1062_v45, %s2188_s9  ;;  %v1523_v45 = vmul.f32 %v2478_v44, %v2550_v58  ;;  %v1253_v44 = vmul.f32 %v2496_v53, %v2550_v58 }
 0x4aa   : > { %v2786_v13 = vpop.permute.xlu1 %619  ;;  %v2788_v36 = vpop.permute.xlu0 %617 }
 0x4ab   : > { %3506 = vst [vmem:[#allocation35_spill] sm:$0xff] %v2786_v13  ;;  %3507 = vst [vmem:[#allocation36_spill] sm:$0xff] %v2788_v36 }
 0x4ac   : > { %1380 = vrot.lane.b32.xlu1 %v1374_v61, %s2187_s7  ;;  %1090 = vrot.lane.b32.xlu0 %v1084_v60, %s2189_s20  ;;  %v1251_v61 = vmul.f32 %v2496_v53, %v2544_v11  ;;  %v1545_v53 = vmul.f32 %v2486_v48, %v2544_v11 }
 0x4ae   : > { %v2796_v4 = vpop.permute.xlu1 %642  ;;  %v2798_v6 = vpop.permute.xlu0 %621 }
 0x4af   : > { %3508 = vst [vmem:[#allocation37_spill] sm:$0xff] %v2796_v4  ;;  %3509 = vst [vmem:[#allocation38_spill] sm:$0xff] %v2798_v6 }
 0x4b0   : > { %1384 = vrot.lane.b32.xlu1 %v1376_v24, %s2187_s7  ;;  %1187 = vrot.lane.b32.xlu0 %v1180_v3, %s2186_s6  ;;  %v1276_v24 = vmul.f32 %v2490_v50, %v2542_v62 }
 0x4b2   : > { %v2806_v26 = vpop.permute.xlu1 %676  ;;  %v2808_v7 = vpop.permute.xlu0 %640 }
 0x4b3   : > { %3510 = vst [vmem:[#allocation39_spill] sm:$0xff] %v2808_v7 }
 0x4b4   : > { %1529 = vrot.lane.b32.xlu1 %v1522_v39, %s2186_s6  ;;  %1209 = vrot.lane.b32.xlu0 %v1203_v25, %s2187_s7  ;;  %v1422_v39 = vmul.f32 %v2494_v52, %v2544_v11 }
 0x4b6   : > { %v2816_v14 = vpop.permute.xlu1 %678  ;;  %v2818_v0 = vpop.permute.xlu0 %644 }
 0x4b7   : > { %3511 = vst [vmem:[#allocation40_spill] sm:$0xff] %v2818_v0 }
 0x4b8   : > { %1094 = vrot.lane.b32.xlu1 %v1086_v49, %s2189_s20  ;;  %1213 = vrot.lane.b32.xlu0 %v1205_v23, %s2187_s7 }
 0x4ba   : > { %v2826_v15 = vpop.permute.xlu1 %702  ;;  %v2828_v38 = vpop.permute.xlu0 %680 }
 0x4bc   : > { %1259 = vrot.lane.b32.xlu1 %v1252_v12, %s2189_s20  ;;  %1358 = vrot.lane.b32.xlu0 %v1351_v27, %s2186_s6  ;;  %v1424_v12 = vmul.f32 %v2494_v52, %v2550_v58  ;;  %v1399_v27 = vmul.f32 %v2482_v46, %v2542_v62  ;;  %v1547_v46 = vmul.f32 %v2486_v48, %v2550_v58 }
 0x4bd   : > { %v1275_v48 = vmul.f32 %v2490_v50, %v2544_v11 }
 0x4be   : > { %v2836_v1 = vpop.permute.xlu1 %726  ;;  %v2838_v30 = vpop.permute.xlu0 %700 }
 0x4c0   : > { %1404 = vrot.lane.b32.xlu1 %v1398_v31, %s2188_s9  ;;  %1233 = vrot.lane.b32.xlu0 %v1227_v40, %s2188_s9 }
 0x4c2   : > { %v2846_v29 = vpop.permute.xlu1 %750  ;;  %v2848_v32 = vpop.permute.xlu0 %704 }
 0x4c4   : > { %1408 = vrot.lane.b32.xlu1 %v1400_v33, %s2188_s9  ;;  %1237 = vrot.lane.b32.xlu0 %v1229_v42, %s2188_s9  ;;  %v1570_v42 = vmul.f32 %v2504_v57, %v2542_v62 }
 0x4c6   : > { %v2856_v9 = vpop.permute.xlu1 %774  ;;  %v2858_v51 = vpop.permute.xlu0 %724 }
 0x4c8   : > { %1553 = vrot.lane.b32.xlu1 %v1546_v41, %s2187_s7  ;;  %1382 = vrot.lane.b32.xlu0 %v1375_v37, %s2187_s7  ;;  %v1132_v41 = vmul.f32 %v2498_v54, %v2544_v11 }
 0x4ca   : > { %v2866_v63 = vpop.permute.xlu1 %798  ;;  %v2868_v43 = vpop.permute.xlu0 %728 }
 0x4cc   : > { %1114 = vrot.lane.b32.xlu1 %v1108_v5, %s2190_s22  ;;  %1527 = vrot.lane.b32.xlu0 %v1521_v19, %s2186_s6 }
 0x4ce   : > { %v848_v21 = vpop.permute.xlu1 %847  ;;  %v2876_v60 = vpop.permute.xlu0 %748 }
 0x4d0   : > { %1118 = vrot.lane.b32.xlu1 %v1110_v18, %s2190_s22  ;;  %1531 = vrot.lane.b32.xlu0 %v1523_v45, %s2186_s6  ;;  %v1134_v18 = vmul.f32 %v2498_v54, %v2550_v58  ;;  %v1109_v45 = vmul.f32 %v2500_v55, %v2542_v62 }
 0x4d2   : > { %v2884_v3 = vpop.permute.xlu1 %851  ;;  %v2886_v25 = vpop.permute.xlu0 %752 }
 0x4d4   : > { %1283 = vrot.lane.b32.xlu1 %v1276_v24, %s2190_s22  ;;  %1257 = vrot.lane.b32.xlu0 %v1251_v61, %s2189_s20 }
 0x4d6   : > { %v872_v49 = vpop.permute.xlu1 %871  ;;  %v2894_v23 = vpop.permute.xlu0 %772 }
 0x4d8   : > { %1428 = vrot.lane.b32.xlu1 %v1422_v39, %s2189_s20  ;;  %1261 = vrot.lane.b32.xlu0 %v1253_v44, %s2189_s20  ;;  %v1300_v44 = vmul.f32 %v2502_v56, %v2542_v62 }
 0x4da   : > { %v874_v40 = vpop.permute.xlu1 %873  ;;  %v2902_v31 = vpop.permute.xlu0 %776 }
 0x4dc   : > { %1432 = vrot.lane.b32.xlu1 %v1424_v12, %s2189_s20  ;;  %1406 = vrot.lane.b32.xlu0 %v1399_v27, %s2188_s9  ;;  %v1277_v27 = vmul.f32 %v2490_v50, %v2550_v58 }
 0x4de   : > { %v898_v33 = vpop.permute.xlu1 %897  ;;  %v2910_v37 = vpop.permute.xlu0 %796 }
 0x4e0   : > { %1577 = vrot.lane.b32.xlu1 %v1570_v42, %s2188_s9  ;;  %1551 = vrot.lane.b32.xlu0 %v1545_v53, %s2187_s7  ;;  %v3512_v53 = vld [vmem:[#allocation10_spill] sm:$0xff] }
 0x4e1   : > { %v834_v42 = vmul.f32 %v3512_v53, %v2544_v11  ;;  %v835_v4 = vmul.f32 %v3512_v53, %v2542_v62  ;;  %v836_v59 = vmul.f32 %v3512_v53, %v2550_v58 }
 0x4e2   : > { %v922_v5 = vpop.permute.xlu1 %921  ;;  %v2918_v19 = vpop.permute.xlu0 %800 }
 0x4e4   : > { %1138 = vrot.lane.b32.xlu1 %v1132_v41, %s2191_s26  ;;  %1555 = vrot.lane.b32.xlu0 %v1547_v46, %s2187_s7  ;;  %v3513_v46 = vld [vmem:[#allocation13_spill] sm:$0xff]  ;;  %s3398_s7 = scalar_lea.hbm %s3450_s4, %s1827_s25 }
 0x4e5   : > { %v1446_v41 = vmul.f32 %v3513_v46, %v2544_v11  ;;  %v1448_v50 = vmul.f32 %v3513_v46, %v2550_v58  ;;  %v1447_v8 = vmul.f32 %v3513_v46, %v2542_v62 }
 0x4e6   : > { %v2926_v61 = vpop.permute.xlu1 %945  ;;  %v850_v24 = vpop.permute.xlu0 %849 }
 0x4e7   : > { %v853_v55 = vsel %vm531_vm7, %v848_v21, %v850_v24 }
 0x4e8   : > { %1142 = vrot.lane.b32.xlu1 %v1134_v18, %s2191_s26  ;;  %1116 = vrot.lane.b32.xlu0 %v1109_v45, %s2190_s22  ;;  %v858_v0 = vadd.f32 %v853_v55, %v834_v42  ;;  %v877_v55 = vsel %vm554_vm8, %v872_v49, %v874_v40 }
 0x4ea   : > { %v2934_v39 = vpop.permute.xlu1 %969  ;;  %v2936_v12 = vpop.permute.xlu0 %875 }
 0x4eb   : > { %v878_v49 = vsel %vm554_vm8, %v874_v40, %v2936_v12  ;;  %v1571_v40 = vmul.f32 %v2504_v57, %v2550_v58  ;;  %v1472_v57 = vmul.f32 %v3516_v47, %v2550_v58 }
 0x4ec   : > { %1307 = vrot.lane.b32.xlu1 %v1300_v44, %s2191_s26  ;;  %1281 = vrot.lane.b32.xlu0 %v1275_v48, %s2190_s22  ;;  %v3514_v48 = vld [vmem:[#allocation11_spill] sm:$0xff]  ;;  %v1423_v44 = vmul.f32 %v2494_v52, %v2542_v62  ;;  %v882_v52 = vadd.f32 %v877_v55, %v858_v0 }
 0x4ed   : > { %v1007_v21 = vmul.f32 %v3514_v48, %v2550_v58 }
 0x4ee   : > { %v2947_v18 = vpop.permute.xlu1 %1018  ;;  %v896_v45 = vpop.permute.xlu0 %895 }
 0x4ef   : > { %v901_v42 = vsel %vm577_vm9, %v896_v45, %v898_v33 }
 0x4f0   : > { %1452 = vrot.lane.b32.xlu1 %v1446_v41, %s2190_s22  ;;  %1285 = vrot.lane.b32.xlu0 %v1277_v27, %s2190_s22  ;;  %v854_v27 = vsel %vm531_vm7, %v850_v24, %v2884_v3  ;;  %v3515_v24 = vld [vmem:[#allocation12_spill] sm:$0xff]  ;;  %v906_v36 = vadd.f32 %v901_v42, %v882_v52 }
 0x4f1   : > { %v1594_v45 = vmul.f32 %v3515_v24, %v2542_v62 }
 0x4f2   : > { %v2957_v6 = vpop.permute.xlu1 %1022  ;;  %v2959_v7 = vpop.permute.xlu0 %899 }
 0x4f3   : > { %v2966_v41 = vadd.f32 %v2957_v6, %v1007_v21  ;;  %v859_v21 = vadd.f32 %v854_v27, %v835_v4  ;;  %v902_v0 = vsel %vm577_vm9, %v898_v33, %v2959_v7  ;;  %v1470_v4 = vmul.f32 %v3516_v47, %v2544_v11 }
 0x4f4   : > { %1456 = vrot.lane.b32.xlu1 %v1448_v50, %s2190_s22  ;;  %1430 = vrot.lane.b32.xlu0 %v1423_v44, %s2189_s20 }
 0x4f5   : > { %v883_v44 = vadd.f32 %v878_v49, %v859_v21 }
 0x4f6   : > { %v1043_v13 = vpop.permute.xlu1 %1042  ;;  %v920_v35 = vpop.permute.xlu0 %919 }
 0x4f7   : > { %v925_v50 = vsel %vm600_vm10, %v920_v35, %v922_v5  ;;  %v907_v27 = vadd.f32 %v902_v0, %v883_v44  ;;  %v3517_v0 = vld [vmem:[#allocation15_spill] sm:$0xff] }
 0x4f8   : > { %v930_v55 = vadd.f32 %v925_v50, %v906_v36  ;;  %1601 = vrot.lane.b32.xlu1 %v1594_v45, %s2189_s20  ;;  %1575 = vrot.lane.b32.xlu0 %v1569_v22, %s2188_s9  ;;  %v1133_v22 = vmul.f32 %v2498_v54, %v2542_v62  ;;  %v1618_v50 = vmul.f32 %v3517_v0, %v2542_v62  ;;  %v3518_v54 = vld [vmem:[#allocation8_spill] sm:$0xff] }
 0x4f9   : > { %v665_v44 = vmul.f32 %v3518_v54, %v2550_v58 }
 0x4fa   : > { %v2987_v42 = vpop.permute.xlu1 %1044  ;;  %v924_v52 = vpop.permute.xlu0 %923 }
 0x4fb   : > { %v2991_v33 = vsel %vm554_vm8, %v1043_v13, %v2987_v42  ;;  %v926_v35 = vsel %vm600_vm10, %v922_v5, %v924_v52  ;;  %v1299_v5 = vmul.f32 %v2502_v56, %v2544_v11 }
 0x4fc   : > { %v931_v36 = vadd.f32 %v926_v35, %v907_v27  ;;  %1476 = vrot.lane.b32.xlu1 %v1470_v4, %s2191_s26  ;;  %1579 = vrot.lane.b32.xlu0 %v1571_v40, %s2188_s9  ;;  %s2197_s9 = smov [#allocation5]  }
 0x4fe   : > { %v3000_v49 = vpop.permute.xlu1 %1068  ;;  %v944_v45 = vpop.permute.xlu0 %943 }
 0x4ff   : > { %v949_v13 = vsel %vm623_vm11, %v944_v45, %v2926_v61 }
 0x500   : > { %v954_v21 = vadd.f32 %v949_v13, %v930_v55  ;;  %1480 = vrot.lane.b32.xlu1 %v1472_v57, %s2191_s26  ;;  %1140 = vrot.lane.b32.xlu0 %v1133_v22, %s2191_s26  ;;  %v689_v55 = vadd.f32 %v2828_v38, %v665_v44  ;;  %v1301_v57 = vmul.f32 %v2502_v56, %v2550_v58  ;;  %v3519_v22 = vld [vmem:[#allocation16_spill] sm:$0xff] }
 0x501   : > { %v1641_v45 = vmul.f32 %v3519_v22, %v2544_v11  ;;  %v1643_v53 = vmul.f32 %v3519_v22, %v2550_v58 }
 0x502   : > { %v3012_v40 = vpop.permute.xlu1 %1092  ;;  %v948_v4 = vpop.permute.xlu0 %947  ;;  %v713_v13 = vadd.f32 %v2848_v32, %v689_v55 }
 0x503   : > { %v950_v27 = vsel %vm623_vm11, %v2926_v61, %v948_v4 }
 0x504   : > { %v955_v35 = vadd.f32 %v950_v27, %v931_v36  ;;  %1625 = vrot.lane.b32.xlu1 %v1618_v50, %s2190_s22  ;;  %1305 = vrot.lane.b32.xlu0 %v1299_v5, %s2191_s26  ;;  %v737_v5 = vadd.f32 %v2868_v43, %v713_v13  ;;  %v860_v50 = vadd.f32 %v2884_v3, %v836_v59  ;;  %v3520_v27 = vld [vmem:[#allocation18_spill] sm:$0xff] }
 0x505   : > { %v1174_v55 = vmul.f32 %v3520_v27, %v2550_v58 }
 0x506   : > { %v3026_v61 = vpop.permute.xlu1 %1185  ;;  %v968_v44 = vpop.permute.xlu0 %967  ;;  %v884_v13 = vadd.f32 %v2936_v12, %v860_v50  ;;  %v1593_v12 = vmul.f32 %v3515_v24, %v2544_v11 }
 0x507   : > { %v973_v36 = vsel %vm646_vm12, %v968_v44, %v2934_v39  ;;  %v761_v44 = vadd.f32 %v2886_v25, %v737_v5 }
 0x508   : > { %v3032_v56 = vadd.f32 %v973_v36, %v954_v21  ;;  %1647 = vrot.lane.b32.xlu1 %v1641_v45, %s2191_s26  ;;  %1309 = vrot.lane.b32.xlu0 %v1301_v57, %s2191_s26  ;;  %v908_v36 = vadd.f32 %v2959_v7, %v884_v13 }
 0x509   : > { %v785_v45 = vadd.f32 %v2902_v31, %v761_v44 }
 0x50a   : > { %v1190_v59 = vpop.permute.xlu1 %1189  ;;  %v972_v3 = vpop.permute.xlu0 %971  ;;  %v932_v5 = vadd.f32 %v924_v52, %v908_v36  ;;  %v1595_v52 = vmul.f32 %v3515_v24, %v2550_v58 }
 0x50b   : > { %v3044_v21 = vadd.f32 %v1190_v59, %v1174_v55  ;;  %v974_v57 = vsel %vm646_vm12, %v2934_v39, %v972_v3  ;;  %v809_v46 = vadd.f32 %v2918_v19, %v785_v45  ;;  %v1005_v39 = vmul.f32 %v3514_v48, %v2544_v11 }
 0x50c   : > { %v3050_v34 = vadd.f32 %v974_v57, %v955_v35  ;;  %1651 = vrot.lane.b32.xlu1 %v1643_v53, %s2191_s26  ;;  %1454 = vrot.lane.b32.xlu0 %v1447_v8, %s2190_s22  ;;  %v1006_v55 = vmul.f32 %v3514_v48, %v2542_v62  ;;  %v956_v53 = vadd.f32 %v948_v4, %v932_v5 }
 0x50e   : > { %v1212_v50 = vpop.permute.xlu1 %1211  ;;  %v1021_v7 = vpop.permute.xlu0 %1020  ;;  %v980_v57 = vadd.f32 %v972_v3, %v956_v53  ;;  %v1471_v3 = vmul.f32 %v3516_v47, %v2542_v62 }
 0x50f   : > { %v1024_v35 = vsel %vm531_vm7, %v2947_v18, %v1021_v7  ;;  %v1025_v8 = vsel %vm531_vm7, %v1021_v7, %v2957_v6 }
 0x510   : > { %v1029_v44 = vadd.f32 %v1024_v35, %v1005_v39  ;;  %v1030_v13 = vadd.f32 %v1025_v8, %v1006_v55  ;;  %1599 = vrot.lane.b32.xlu0 %v1593_v12, %s2189_s20  ;;  %819 = vrot.lane.b32.xlu1 %v809_v46, %s2182_s30  ;;  %v3521_v12 = vld [vmem:[#allocation17_spill] sm:$0xff]  ;;  %v1617_v39 = vmul.f32 %v3517_v0, %v2544_v11 }
 0x511   : > { %v1345_v24 = vmul.f32 %v3521_v12, %v2550_v58  ;;  %v1619_v8 = vmul.f32 %v3517_v0, %v2550_v58 }
 0x512   : > { %v1357_v45 = vpop.permute.xlu1 %1356  ;;  %v1047_v48 = vpop.permute.xlu0 %1046  ;;  %v1053_v36 = vadd.f32 %v2991_v33, %v1029_v44 }
 0x513   : > { %v1049_v18 = vsel %vm554_vm8, %v2987_v42, %v1047_v48  ;;  %v3073_v6 = vadd.f32 %v1047_v48, %v2966_v41 }
 0x514   : > { %v1054_v4 = vadd.f32 %v1049_v18, %v1030_v13  ;;  %1603 = vrot.lane.b32.xlu0 %v1595_v52, %s2189_s20  ;;  %990 = vrot.lane.b32.xlu1 %v980_v57, %s2192_s8  ;;  %v1642_v57 = vmul.f32 %v3519_v22, %v2542_v62  ;;  %s2065_s20 = sshll.u32 %s2197_s9, 4  ;;  %s2066_s20 = int_to_ptr.vmem [resolvable:$false] %s2065_s20 }
 0x516   : > { %v1361_v46 = vpop.permute.xlu1 %1360  ;;  %v1067_v33 = vpop.permute.xlu0 %1066 }
 0x517   : > { %v1369_v5 = vadd.f32 %v1361_v46, %v1345_v24  ;;  %v1072_v42 = vsel %vm577_vm9, %v1067_v33, %v3000_v49 }
 0x518   : > { %v1077_v41 = vadd.f32 %v1072_v42, %v1053_v36  ;;  %1478 = vrot.lane.b32.xlu0 %v1471_v3, %s2191_s26  ;;  %v1173_v36 = vmul.f32 %v3520_v27, %v2542_v62 }
 0x51a   : > { %v1236_v55 = vpop.permute.xlu1 %1235  ;;  %v3086_v7 = vpop.permute.xlu0 %1070 }
 0x51b   : > { %v1073_v35 = vsel %vm577_vm9, %v3000_v49, %v3086_v7  ;;  %v1172_v49 = vmul.f32 %v3520_v27, %v2544_v11 }
 0x51c   : > { %v1078_v47 = vadd.f32 %v1073_v35, %v1054_v4  ;;  %1623 = vrot.lane.b32.xlu0 %v1617_v39, %s2190_s22 }
 0x51e   : > { %v1381_v53 = vpop.permute.xlu1 %1380  ;;  %v1091_v44 = vpop.permute.xlu0 %1090 }
 0x51f   : > { %v1096_v13 = vsel %vm600_vm10, %v1091_v44, %v3012_v40 }
 0x520   : > { %v3096_v52 = vadd.f32 %v1096_v13, %v1077_v41  ;;  %1627 = vrot.lane.b32.xlu0 %v1619_v8, %s2190_s22  ;;  %s2067_s22 = scalar_lea.vmem %s2066_s20, 1024 }
 0x522   : > { %v1385_v48 = vpop.permute.xlu1 %1384  ;;  %v1188_v0 = vpop.permute.xlu0 %1187 }
 0x523   : > { %v3105_v18 = vadd.f32 %v1385_v48, %v1369_v5  ;;  %v1191_v4 = vsel %vm531_vm7, %v3026_v61, %v1188_v0  ;;  %v1192_v24 = vsel %vm531_vm7, %v1188_v0, %v1190_v59 }
 0x524   : > { %v1196_v3 = vadd.f32 %v1191_v4, %v1172_v49  ;;  %v1197_v33 = vadd.f32 %v1192_v24, %v1173_v36  ;;  %1649 = vrot.lane.b32.xlu0 %v1642_v57, %s2191_s26  ;;  %v1343_v57 = vmul.f32 %v3521_v12, %v2544_v11  ;;  %v1344_v49 = vmul.f32 %v3521_v12, %v2542_v62 }
 0x526   : > { %v1530_v22 = vpop.permute.xlu1 %1529  ;;  %v1210_v42 = vpop.permute.xlu0 %1209 }
 0x527   : > { %v1215_v41 = vsel %vm554_vm8, %v1210_v42, %v1212_v50 }
 0x528   : > { %v1220_v39 = vadd.f32 %v1215_v41, %v1196_v3 }
 0x52a   : > { %v1095_v35 = vpop.permute.xlu1 %1094  ;;  %v1214_v8 = vpop.permute.xlu0 %1213 }
 0x52b   : > { %v1097_v27 = vsel %vm600_vm10, %v3012_v40, %v1095_v35  ;;  %v1216_v5 = vsel %vm554_vm8, %v1212_v50, %v1214_v8  ;;  %v3116_v61 = vadd.f32 %v1214_v8, %v3044_v21 }
 0x52c   : > { %v3118_v59 = vadd.f32 %v1097_v27, %v1078_v47  ;;  %v1221_v44 = vadd.f32 %v1216_v5, %v1197_v33 }
 0x52e   : > { %v1260_v13 = vpop.permute.xlu1 %1259  ;;  %v1359_v36 = vpop.permute.xlu0 %1358 }
 0x52f   : > { %v1362_v0 = vsel %vm531_vm7, %v1357_v45, %v1359_v36  ;;  %v1363_v40 = vsel %vm531_vm7, %v1359_v36, %v1361_v46 }
 0x530   : > { %v1367_v4 = vadd.f32 %v1362_v0, %v1343_v57  ;;  %v1368_v50 = vadd.f32 %v1363_v40, %v1344_v49 }
 0x532   : > { %v1405_v24 = vpop.permute.xlu1 %1404  ;;  %v1234_v21 = vpop.permute.xlu0 %1233 }
 0x533   : > { %v1239_v47 = vsel %vm577_vm9, %v1234_v21, %v1236_v55 }
 0x534   : > { %v1244_v3 = vadd.f32 %v1239_v47, %v1220_v39  ;;  %v3522_v39 = vld [vmem:[#allocation19_spill] sm:$0xff] }
 0x535   : > { %v1514_v36 = vmul.f32 %v3522_v39, %v2544_v11 }
 0x536   : > { %v3127_v33 = vpop.permute.xlu1 %1408  ;;  %v3129_v42 = vpop.permute.xlu0 %1237 }
 0x537   : > { %v1240_v41 = vsel %vm577_vm9, %v1236_v55, %v3129_v42  ;;  %v1516_v55 = vmul.f32 %v3522_v39, %v2550_v58 }
 0x538   : > { %v1245_v12 = vadd.f32 %v1240_v41, %v1221_v44 }
 0x53a   : > { %v1554_v8 = vpop.permute.xlu1 %1553  ;;  %v1383_v27 = vpop.permute.xlu0 %1382 }
 0x53b   : > { %v1386_v45 = vsel %vm554_vm8, %v1381_v53, %v1383_v27  ;;  %v1387_v46 = vsel %vm554_vm8, %v1383_v27, %v1385_v48  ;;  %v1515_v53 = vmul.f32 %v3522_v39, %v2542_v62 }
 0x53c   : > { %v1391_v5 = vadd.f32 %v1386_v45, %v1367_v4  ;;  %v1392_v57 = vadd.f32 %v1387_v46, %v1368_v50 }
 0x53e   : > { %v3135_v49 = vpop.permute.xlu1 %1114  ;;  %v1528_v0 = vpop.permute.xlu0 %1527 }
 0x53f   : > { %v1533_v40 = vsel %vm531_vm7, %v1528_v0, %v1530_v22 }
 0x540   : > { %v1538_v21 = vadd.f32 %v1533_v40, %v1514_v36 }
 0x542   : > { %v1119_v44 = vpop.permute.xlu1 %1118  ;;  %v1532_v47 = vpop.permute.xlu0 %1531 }
 0x543   : > { %v1534_v48 = vsel %vm531_vm7, %v1530_v22, %v1532_v47  ;;  %v3145_v4 = vadd.f32 %v1532_v47, %v1516_v55 }
 0x544   : > { %v1539_v50 = vadd.f32 %v1534_v48, %v1515_v53 }
 0x546   : > { %v3147_v41 = vpop.permute.xlu1 %1283  ;;  %v1258_v27 = vpop.permute.xlu0 %1257 }
 0x547   : > { %v1263_v45 = vsel %vm600_vm10, %v1258_v27, %v1260_v13 }
 0x548   : > { %v1268_v46 = vadd.f32 %v1263_v45, %v1244_v3 }
 0x54a   : > { %v3150_v36 = vpop.permute.xlu1 %1428  ;;  %v3152_v0 = vpop.permute.xlu0 %1261 }
 0x54b   : > { %v1264_v58 = vsel %vm600_vm10, %v1260_v13, %v3152_v0 }
 0x54c   : > { %v3156_v39 = vadd.f32 %v1264_v58, %v1245_v12  ;;  %v1079_v12 = vadd.f32 %v3086_v7, %v3073_v6 }
 0x54e   : > { %v3158_v40 = vpop.permute.xlu1 %1432  ;;  %v1407_v22 = vpop.permute.xlu0 %1406  ;;  %v1103_v20 = vadd.f32 %v1095_v35, %v1079_v12 }
 0x54f   : > { %v1410_v55 = vsel %vm577_vm9, %v1405_v24, %v1407_v22  ;;  %v1411_v53 = vsel %vm577_vm9, %v1407_v22, %v3127_v33 }
 0x550   : > { %v3163_v47 = vadd.f32 %v1410_v55, %v1391_v5  ;;  %v3165_v3 = vadd.f32 %v1411_v53, %v1392_v57  ;;  %v1127_v22 = vadd.f32 %v1119_v44, %v1103_v20 }
 0x552   : > { %v3167_v48 = vpop.permute.xlu1 %1577  ;;  %v1552_v27 = vpop.permute.xlu0 %1551 }
 0x553   : > { %v1557_v45 = vsel %vm554_vm8, %v1552_v27, %v1554_v8 }
 0x554   : > { %v3170_v13 = vadd.f32 %v1557_v45, %v1538_v21 }
 0x556   : > { %v3174_v58 = vpop.permute.xlu1 %1138  ;;  %v3176_v24 = vpop.permute.xlu0 %1555 }
 0x557   : > { %v1558_v5 = vsel %vm554_vm8, %v1554_v8, %v3176_v24 }
 0x558   : > { %v3180_v57 = vadd.f32 %v1558_v5, %v1539_v50 }
 0x55a   : > { %v3182_v55 = vpop.permute.xlu1 %1142  ;;  %v1117_v53 = vpop.permute.xlu0 %1116 }
 0x55b   : > { %v1151_v21 = vadd.f32 %v3182_v55, %v1127_v22  ;;  %v1121_v27 = vsel %vm623_vm11, %v1117_v53, %v1119_v44 }
 0x55c   : > { %v3187_v6 = vadd.f32 %v1121_v27, %v3118_v59  ;;  %v683_v59 = vsel %vm531_vm7, %v2816_v14, %v2828_v38 }
 0x55d   : > { %1159 = vrot.lane.b32.xlu0 %v1151_v21, %s2193_s10  ;;  %v664_v21 = vmul.f32 %v3518_v54, %v2542_v62  ;;  %v755_v62 = vsel %vm600_vm10, %v2846_v29, %v2886_v25  ;;  %v1246_v25 = vadd.f32 %v3129_v42, %v3116_v61  ;;  %v778_v61 = vsel %vm623_vm11, %v2894_v23, %v2856_v9 }
 0x55e   : > { %v3190_v7 = vpop.permute.xlu1 %1307  ;;  %v1282_v35 = vpop.permute.xlu0 %1281 }
 0x55f   : > { %v1287_v8 = vsel %vm623_vm11, %v1282_v35, %v3147_v41  ;;  %v688_v27 = vadd.f32 %v683_v59, %v664_v21  ;;  %v1417_v35 = vadd.f32 %v3127_v33, %v3105_v18  ;;  %v682_v18 = vsel %vm531_vm7, %v2806_v26, %v2816_v14 }
 0x560   : > { %v3194_v20 = vadd.f32 %v1287_v8, %v1268_v46  ;;  %v707_v46 = vsel %vm554_vm8, %v2826_v15, %v2848_v32  ;;  %v731_v8 = vsel %vm577_vm9, %v2836_v1, %v2868_v43  ;;  %v779_v43 = vsel %vm623_vm11, %v2856_v9, %v2902_v31 }
 0x561   : > { %v712_v2 = vadd.f32 %v707_v46, %v688_v27  ;;  %v1441_v10 = vadd.f32 %v3158_v40, %v1417_v35  ;;  %v663_v46 = vmul.f32 %v3518_v54, %v2544_v11 }
 0x562   : > { %v3196_v50 = vpop.permute.xlu1 %1452  ;;  %v1286_v45 = vpop.permute.xlu0 %1285 }
 0x563   : > { %v736_v32 = vadd.f32 %v731_v8, %v712_v2  ;;  %v706_v2 = vsel %vm554_vm8, %v2838_v30, %v2826_v15  ;;  %v687_v26 = vadd.f32 %v682_v18, %v663_v46  ;;  %v1270_v15 = vadd.f32 %v3152_v0, %v1246_v25 }
 0x564   : > { %v754_v30 = vsel %vm600_vm10, %v2876_v60, %v2846_v29  ;;  %v802_v0 = vsel %vm646_vm12, %v2910_v37, %v2866_v63  ;;  %v1288_v9 = vsel %vm623_vm11, %v3147_v41, %v1286_v45 }
 0x565   : > { %v760_v27 = vadd.f32 %v755_v62, %v736_v32  ;;  %v730_v62 = vsel %vm577_vm9, %v2858_v51, %v2836_v1  ;;  %v711_v54 = vadd.f32 %v706_v2, %v687_v26  ;;  %v1294_v32 = vadd.f32 %v1286_v45, %v1270_v15 }
 0x566   : > { %v3198_v12 = vpop.permute.xlu1 %1456  ;;  %v3200_v44 = vpop.permute.xlu0 %1430  ;;  %v1120_v1 = vsel %vm623_vm11, %v3135_v49, %v1117_v53  ;;  %v1293_v37 = vadd.f32 %v1288_v9, %v3156_v39  ;;  %v1564_v26 = vadd.f32 %v3176_v24, %v3145_v4 }
 0x567   : > { %v1465_v59 = vadd.f32 %v3198_v12, %v1441_v10  ;;  %v803_v10 = vsel %vm646_vm12, %v2866_v63, %v2918_v19  ;;  %v784_v14 = vadd.f32 %v779_v43, %v760_v27  ;;  %v735_v19 = vadd.f32 %v730_v62, %v711_v54 }
 0x568   : > { %v1125_v18 = vadd.f32 %v1120_v1, %v3096_v52  ;;  %v1434_v41 = vsel %vm600_vm10, %v3150_v36, %v3200_v44  ;;  %v1435_v46 = vsel %vm600_vm10, %v3200_v44, %v3158_v40 }
 0x569   : > { %v808_v8 = vadd.f32 %v803_v10, %v784_v14  ;;  %v759_v42 = vadd.f32 %v754_v30, %v735_v19 }
 0x56a   : > { %v3205_v5 = vpop.permute.xlu1 %1601  ;;  %v3207_v22 = vpop.permute.xlu0 %1575 }
 0x56b   : > { %v783_v60 = vadd.f32 %v778_v61, %v759_v42 }
 0x56d   : > { %v807_v49 = vadd.f32 %v802_v0, %v783_v60 }
 0x56e   : > { %v3219_v38 = vpop.permute.xlu1 %1476  ;;  %v3221_v17 = vpop.permute.xlu0 %1579 }
 0x572   : > { %v1481_v33 = vpop.permute.xlu1 %1480  ;;  %v1141_v21 = vpop.permute.xlu0 %1140 }
 0x573   : > { %v1489_v35 = vadd.f32 %v1481_v33, %v1465_v59  ;;  %v1144_v29 = vsel %vm646_vm12, %v3174_v58, %v1141_v21  ;;  %v1145_v58 = vsel %vm646_vm12, %v1141_v21, %v3182_v55  ;;  %v1439_v55 = vadd.f32 %v1434_v41, %v3163_v47 }
 0x574   : > { %v1149_v53 = vadd.f32 %v1144_v29, %v1125_v18  ;;  %v1150_v39 = vadd.f32 %v1145_v58, %v3187_v6 }
 0x575   : > { %1499 = vrot.lane.b32.xlu0 %v1489_v35, %s2194_s11  ;;  %v1440_v35 = vadd.f32 %v1435_v46, %v3165_v3  ;;  %v1582_v3 = vsel %vm577_vm9, %v3167_v48, %v3221_v17 }
 0x576   : > { %v1306_v31 = vpop.permute.xlu0 %1305 }
 0x577   : > { %v1311_v36 = vsel %vm646_vm12, %v1306_v31, %v3190_v7  ;;  %v1588_v31 = vadd.f32 %v3221_v17, %v1564_v26  ;;  %v492_v17 = vlaneseq }
 0x579   : > { %817 = vrot.lane.b32.xlu0 %v808_v8, %s2182_s30 }
 0x57a   : > { %v1310_v51 = vpop.permute.xlu0 %1309 }
 0x57b   : > { %v1318_v59 = vadd.f32 %v1310_v51, %v1294_v32  ;;  %v1312_v63 = vsel %vm646_vm12, %v3190_v7, %v1310_v51  ;;  %v493_v51 = vand.u32 127, %v492_v17 }
 0x57d   : > { %988 = vrot.lane.b32.xlu0 %v3050_v34, %s2192_s8  ;;  %1328 = vrot.lane.b32.xlu1 %v1318_v59, %s2195_s12  ;;  %v1317_v34 = vadd.f32 %v1312_v63, %v1293_v37  ;;  %v494_v0 = vadd.s32 128, %v493_v51  ;;  %v495_v29 = vcvt.s32.f32 %v493_v51 }
 0x57e   : > { %v1455_v23 = vpop.permute.xlu0 %1454 }
 0x57f   : > { %v1458_v43 = vsel %vm623_vm11, %v3196_v50, %v1455_v23  ;;  %v1459_v21 = vsel %vm623_vm11, %v1455_v23, %v3198_v12  ;;  %v1316_v50 = vadd.f32 %v1311_v36, %v3194_v20  ;;  %v1581_v12 = vsel %vm577_vm9, %v3207_v22, %v3167_v48 }
 0x580   : > { %v1463_v27 = vadd.f32 %v1458_v43, %v1439_v55  ;;  %v1464_v2 = vadd.f32 %v1459_v21, %v1440_v35  ;;  %v1586_v14 = vadd.f32 %v1581_v12, %v3170_v13  ;;  %v1587_v22 = vadd.f32 %v1582_v3, %v3180_v57  ;;  %v3532_v12 = vld [vmem:[#allocation32_spill] sm:$0xff] }
 0x581   : > { %1155 = vrot.lane.b32.xlu0 %v1149_v53, %s2193_s10  ;;  %815 = vrot.lane.b32.xlu1 %v807_v49, %s2182_s30  ;;  %v496_v18 = vcvt.s32.f32 %v494_v0  ;;  %v498_v23 = vmul.f32 0.0625, %v495_v29  ;;  %s1731_s30 = sshll.u32 %s215_s29, 4  ;;  %s3400_s30 = int_to_ptr.vmem [resolvable:$true] %s1731_s30 }
 0x582   : > { %v1600_v52 = vpop.permute.xlu0 %1599  ;;  %s2061_s14 = scalar_lea.vmem %s3400_s30, 512  ;;  %p2068_p8 = scmp.lt.s32.totalorder %s3400_s30, %s2066_s20 }
 0x583   : > { %v499_v49 = vmul.f32 0.0625, %v496_v18  ;;  %v500_v63 = vadd.f32 0.03125, %v498_v23  ;;  %p2062_p6 = scmp.ne.s32.totalorder %s3400_s30, %s2061_s14  ;;  %p2069_p10 = scmp.lt.s32.totalorder %s2067_s22, %s2061_s14 }
 0x585   : > { %986 = vrot.lane.b32.xlu1 %v3032_v56, %s2192_s8  ;;  %1326 = vrot.lane.b32.xlu0 %v1317_v34, %s2195_s12  ;;  %v1626_v56 = vpop.permute.xlu1 %1625  ;;  %v3523_v34 = vld [vmem:[#allocation9_spill] sm:$0xff]  ;;  %v501_v41 = vadd.f32 0.03125, %v499_v49  ;;  %v502_v46 = vfloor.f32 %v500_v63  ;;  %v3540_v49 = vld [vmem:[#allocation40_spill] sm:$0xff]  ;;  %p2063_p12 = pnand %p2062_p6, %p3545_p11  ;;  %p2070_p0 = por %p2069_p10, %p2068_p8 }
 0x586   : > { %v1604_v45 = vpop.permute.xlu0 %1603  ;;  %v513_v58 = vmul.f32 %v3523_v34, %v2544_v11 }
 0x587   : > { %p2064_p13 = pneg %p2063_p12 }
 0x589   : > { %1157 = vrot.lane.b32.xlu1 %v1150_v39, %s2193_s10  ;;  %v1648_v10 = vpop.permute.xlu1 %1647  ;;  %v3525_v39 = vld [vmem:[#allocation27_spill] sm:$0xff]  ;;  %p2071_p2 = pnand %p2070_p0, %p2064_p13 }
 0x58a   : > { %v1479_v6 = vpop.permute.xlu0 %1478 }
 0x58b   : > { %v1482_v40 = vsel %vm646_vm12, %v3219_v38, %v1479_v6  ;;  %v1483_v47 = vsel %vm646_vm12, %v1479_v6, %v1481_v33  ;;  %v1605_v38 = vsel %vm600_vm10, %v1600_v52, %v3205_v5  ;;  %v1606_v33 = vsel %vm600_vm10, %v3205_v5, %v1604_v45  ;;  %v3528_v6 = vld [vmem:[#allocation28_spill] sm:$0xff] }
 0x58c   : > { %v1487_v44 = vadd.f32 %v1482_v40, %v1463_v27  ;;  %v1488_v20 = vadd.f32 %v1483_v47, %v1464_v2  ;;  %v1610_v54 = vadd.f32 %v1605_v38, %v1586_v14  ;;  %v1611_v8 = vadd.f32 %v1606_v33, %v1587_v22  ;;  %v3527_v27 = vld [vmem:[#allocation31_spill] sm:$0xff]  ;;  %v3533_v33 = vld [vmem:[#allocation30_spill] sm:$0xff]  ;;  %v3535_v22 = vld [vmem:[#allocation36_spill] sm:$0xff] }
 0x58d   : > { %1324 = vrot.lane.b32.xlu1 %v1316_v50, %s2195_s12  ;;  %v1652_v15 = vpop.permute.xlu1 %1651  ;;  %v1612_v5 = vadd.f32 %v1604_v45, %v1588_v31  ;;  %v532_v52 = vsel %vm531_vm7, %v2724_v16, %v2726_v28  ;;  %v3524_v45 = vld [vmem:[#allocation29_spill] sm:$0xff]  ;;  %v578_v35 = vsel %vm577_vm9, %v3528_v6, %v3527_v27  ;;  %v3529_v16 = vld [vmem:[#allocation24_spill] sm:$0xff]  ;;  %v503_v40 = vfloor.f32 %v501_v41  ;;  %v3534_v14 = vld [vmem:[#allocation35_spill] sm:$0xff] }
 0x58e   : > { %1495 = vrot.lane.b32.xlu0 %v1487_v44, %s2194_s11  ;;  %v1624_v7 = vpop.permute.xlu0 %1623  ;;  %v555_v43 = vsel %vm554_vm8, %v3525_v39, %v3524_v45  ;;  %v536_v36 = vadd.f32 %v532_v52, %v513_v58  ;;  %v514_v50 = vmul.f32 %v3523_v34, %v3529_v16  ;;  %v3530_v44 = vld [vmem:[#allocation26_spill] sm:$0xff]  ;;  %v579_v26 = vsel %vm577_vm9, %v3527_v27, %v3533_v33 }
 0x58f   : > { %v1629_v48 = vsel %vm623_vm11, %v1624_v7, %v1626_v56  ;;  %v556_v2 = vsel %vm554_vm8, %v3524_v45, %v3530_v44  ;;  %v3531_v7 = vld [vmem:[#allocation33_spill] sm:$0xff]  ;;  %v505_v31 = vmul.f32 16.0, %v503_v40 }
 0x590   : > { %v1634_v30 = vadd.f32 %v1629_v48, %v1610_v54  ;;  %v559_v11 = vadd.f32 %v555_v43, %v536_v36  ;;  %v601_v3 = vsel %vm600_vm10, %v3532_v12, %v3531_v7  ;;  %v3536_v54 = vld [vmem:[#allocation34_spill] sm:$0xff] }
 0x591   : > { %1497 = vrot.lane.b32.xlu1 %v1488_v20, %s2194_s11  ;;  %v820_v42 = vpop.permute.xlu1 %819  ;;  %v504_v20 = vmul.f32 16.0, %v502_v46  ;;  %v507_v23 = vsub.f32 %v496_v18, %v505_v31 }
 0x592   : > { %v1628_v25 = vpop.permute.xlu0 %1627  ;;  %v582_v38 = vadd.f32 %v578_v35, %v559_v11 }
 0x593   : > { %v1630_v62 = vsel %vm623_vm11, %v1626_v56, %v1628_v25  ;;  %v1636_v24 = vadd.f32 %v1628_v25, %v1612_v5  ;;  %v3526_v56 = vld [vmem:[#allocation25_spill] sm:$0xff]  ;;  %v624_v25 = vsel %vm623_vm11, %v3535_v22, %v3534_v14  ;;  %v3538_v5 = vld [vmem:[#allocation39_spill] sm:$0xff]  ;;  %vm811_vm2 = vcmp.ge.f32.partialorder %v507_v23, 2.0 }
 0x594   : > { %v1635_v19 = vadd.f32 %v1630_v62, %v1611_v8  ;;  %v533_v21 = vsel %vm531_vm7, %v2726_v28, %v3526_v56  ;;  %v605_v62 = vadd.f32 %v601_v3, %v582_v38  ;;  %v602_v8 = vsel %vm600_vm10, %v3531_v7, %v3536_v54 }
 0x595   : > { %v1660_v1 = vadd.f32 %v1652_v15, %v1636_v24  ;;  %v991_v9 = vpop.permute.xlu1 %990  ;;  %vm654_vm3 = vcmp.ge.f32.partialorder %v507_v23, 3.0  ;;  %vm982_vm4 = vcmp.ge.f32.partialorder %v507_v23, 1.0  ;;  %vm1501_vm7 = vcmask 1006592  }
 0x596   : > { %v1650_v32 = vpop.permute.xlu0 %1649  ;;  %vm1320_vm10 = vcmp.le.f32.partialorder %v507_v23, 14.0 }
 0x597   : > { %v1653_v4 = vsel %vm646_vm12, %v1648_v10, %v1650_v32  ;;  %v1654_v13 = vsel %vm646_vm12, %v1650_v32, %v1652_v15  ;;  %v537_v10 = vadd.f32 %v533_v21, %v514_v50  ;;  %v3537_v15 = vld [vmem:[#allocation37_spill] sm:$0xff] }
 0x598   : > { %v1658_v57 = vadd.f32 %v1653_v4, %v1634_v30  ;;  %v1659_v61 = vadd.f32 %v1654_v13, %v1635_v19  ;;  %v647_v30 = vsel %vm646_vm12, %v3538_v5, %v3537_v15  ;;  %v3362_v19 = vsub.f32 %v495_v29, %v504_v20 }
 0x599   : > { %v560_v48 = vadd.f32 %v556_v2, %v537_v10  ;;  %v628_v13 = vadd.f32 %v624_v25, %v605_v62  ;;  %v648_v29 = vsel %vm646_vm12, %v3537_v15, %v3540_v49 }
 0x59a   : > { %1668 = vrot.lane.b32.xlu0 %v1659_v61, %s2196_s23  ;;  %1666 = vrot.lane.b32.xlu1 %v1658_v57, %s2196_s23  ;;  %v3539_v57 = vld [vmem:[#allocation38_spill] sm:$0xff]  ;;  %vm810_vm14 = vcmp.ge.f32.partialorder %v3362_v19, 2.0  ;;  %vm653_vm0 = vcmp.ge.f32.partialorder %v3362_v19, 3.0  ;;  %vm981_vm1 = vcmp.ge.f32.partialorder %v3362_v19, 1.0  ;;  %vm1319_vm8 = vcmp.le.f32.partialorder %v3362_v19, 14.0 }
 0x59b   : > { %v583_v4 = vadd.f32 %v579_v26, %v560_v48  ;;  %v625_v61 = vsel %vm623_vm11, %v3534_v14, %v3539_v57  ;;  %v651_v0 = vadd.f32 %v647_v30, %v628_v13  ;;  %vm1490_vm9 = vcmp.le.f32.partialorder %v3362_v19, 13.0 }
 0x59c   : > { %vm1491_vm11 = vcmp.le.f32.partialorder %v507_v23, 13.0  ;;  %vm1661_vm12 = vcmp.le.f32.partialorder %v3362_v19, 12.0 }
 0x59d   : > { %v606_v51 = vadd.f32 %v602_v8, %v583_v4  ;;  %v655_v18 = vsel %vm653_vm0, %v651_v0, 0.0 }
 0x59e   : > { %1670 = vrot.lane.b32.xlu1 %v1660_v1, %s2196_s23 }
 0x59f   : > { %v629_v34 = vadd.f32 %v625_v61, %v606_v51  ;;  %v3541_v51 = vld [vmem:[#allocation22_spill] sm:$0xff] }
 0x5a1   : > { %v652_v45 = vadd.f32 %v648_v29, %v629_v34  ;;  %v3544_v34 = vld [vmem:[#allocation21_spill] sm:$0xff] }
 0x5cf   : > { %v3322_v59 = vpop.permute.xlu0 %1159 }
 0x5e7   : > { %v3324_v60 = vpop.permute.xlu0 %1499 }
 0x5eb   : > { %v818_v37 = vpop.permute.xlu0 %817 }
 0x5ec   : > { %v823_v41 = vsel %vm821_vm13, %v818_v37, %v820_v42  ;;  %v656_v42 = vsel %vm654_vm3, %v652_v45, 0.0 }
 0x5ed   : > { %v827_v36 = vsel %vm811_vm2, %v823_v41, 0.0 }
 0x5ee   : > { %v829_v16 = vadd.f32 %v827_v36, %v656_v42 }
 0x5ef   : > { %v3326_v53 = vpop.permute.xlu1 %1328  ;;  %v989_v47 = vpop.permute.xlu0 %988 }
 0x5f0   : > { %v994_v46 = vsel %vm992_vm15, %v989_v47, %v991_v9 }
 0x5f3   : > { %v816_v55 = vpop.permute.xlu1 %815  ;;  %v1156_v24 = vpop.permute.xlu0 %1155 }
 0x5f4   : > { %v822_v1 = vsel %vm821_vm13, %v816_v55, %v818_v37  ;;  %v998_v37 = vsel %vm982_vm4, %v994_v46, 0.0  ;;  %vm1672_vm13 = vcmask 998400  }
 0x5f5   : > { %v826_v58 = vsel %vm810_vm14, %v822_v1, 0.0  ;;  %v1000_v40 = vadd.f32 %v998_v37, %v829_v16  ;;  %vm1662_vm14 = vcmp.le.f32.partialorder %v507_v23, 12.0  ;;  %v3542_v23 = vld [vmem:[#allocation20_spill] sm:$0xff] }
 0x5f6   : > { %v828_v55 = vadd.f32 %v826_v58, %v655_v18 }
 0x5f7   : > { %v987_v28 = vpop.permute.xlu1 %986  ;;  %v1327_v43 = vpop.permute.xlu0 %1326 }
 0x5f8   : > { %v993_v63 = vsel %vm992_vm15, %v987_v28, %v989_v47  ;;  %v1332_v2 = vsel %vm1330_vm6, %v1327_v43, %v3326_v53 }
 0x5f9   : > { %v997_v39 = vsel %vm981_vm1, %v993_v63, 0.0  ;;  %v1336_v38 = vsel %vm1320_vm10, %v1332_v2, 0.0 }
 0x5fa   : > { %v999_v21 = vadd.f32 %v997_v39, %v828_v55 }
 0x5fb   : > { %v1158_v32 = vpop.permute.xlu1 %1157 }
 0x5fc   : > { %v1162_v6 = vsel %vm1161_vm5, %v1156_v24, %v1158_v32  ;;  %v1163_v50 = vsel %vm1161_vm5, %v1158_v32, %v3322_v59  ;;  %v1702_v24 = vshrl.u32 %v492_v17, 7  ;;  %v3543_v17 = vld [vmem:[#allocation23_spill] sm:$0xff] }
 0x5fd   : > { %v1166_v47 = vadd.f32 %v1162_v6, %v999_v21  ;;  %v1167_v7 = vadd.f32 %v1163_v50, %v1000_v40 }
 0x5fe   : > { %v1703_v57 = vsub.s32 0, %v1702_v24 }
 0x5ff   : > { %v1325_v52 = vpop.permute.xlu1 %1324  ;;  %v1338_v14 = vadd.f32 %v1336_v38, %v1167_v7 }
 0x600   : > { %v1331_v27 = vsel %vm1330_vm6, %v1325_v52, %v1327_v43  ;;  %v1496_v35 = vpop.permute.xlu0 %1495 }
 0x601   : > { %v1335_v11 = vsel %vm1319_vm8, %v1331_v27, 0.0 }
 0x602   : > { %v1337_v12 = vadd.f32 %v1335_v11, %v1166_v47 }
 0x603   : > { %v1498_v56 = vpop.permute.xlu1 %1497 }
 0x604   : > { %v1502_v9 = vsel %vm1501_vm7, %v1496_v35, %v1498_v56  ;;  %v1503_v3 = vsel %vm1501_vm7, %v1498_v56, %v3324_v60 }
 0x605   : > { %v1506_v44 = vsel %vm1490_vm9, %v1502_v9, 0.0  ;;  %v1507_v33 = vsel %vm1491_vm11, %v1503_v3, 0.0 }
 0x606   : > { %v1508_v59 = vadd.f32 %v1506_v44, %v1337_v12  ;;  %v1509_v48 = vadd.f32 %v1507_v33, %v1338_v14 }
 0x60c   : > { %v1667_v20 = vpop.permute.xlu1 %1666  ;;  %v1669_v28 = vpop.permute.xlu0 %1668 }
 0x60d   : > { %v1673_v10 = vsel %vm1672_vm13, %v1667_v20, %v1669_v28 }
 0x60e   : > { %v1677_v26 = vsel %vm1661_vm12, %v1673_v10, 0.0 }
 0x60f   : > { %v1679_v22 = vadd.f32 %v1677_v26, %v1508_v59 }
 0x610   : > { %v1671_v25 = vpop.permute.xlu1 %1670 }
 0x611   : > { %v1683_v62 = vrot.slane %v1679_v22, 1  ;;  %v1674_v53 = vsel %vm1672_vm13, %v1669_v28, %v1671_v25 }
 0x612   : > { %v1678_v31 = vsel %vm1662_vm14, %v1674_v53, 0.0 }
 0x613   : > { %v1687_v54 = vadd.f32 %v1683_v62, %v1679_v22  ;;  %v1680_v8 = vadd.f32 %v1678_v31, %v1509_v48 }
 0x615   : > { %v1819_v60 = vmul.f32 -1.442695, %v1687_v54  ;;  %v1684_v15 = vrot.slane %v1680_v8, 1 }
 0x617   : > { %2023 = vpow2.f32 %v1819_v60  ;;  %v1688_v5 = vadd.f32 %v1684_v15, %v1680_v8 }
 0x619   : > { %v1820_v30 = vmul.f32 -1.442695, %v1688_v5 }
 0x61b   : > { %2025 = vpow2.f32 %v1820_v30 }
 0x621   : > { %v2024_v19 = vpop.eup %2023 }
 0x622   : > { %v1695_v32 = vadd.f32 1.0, %v2024_v19 }
 0x624   : > { %2027 = vrcp.f32 %v1695_v32 }
 0x625   : > { %v2026_v4 = vpop.eup %2025 }
 0x626   : > { %v1696_v13 = vadd.f32 1.0, %v2026_v4 }
 0x628   : > { %2029 = vrcp.f32 %v1696_v13 }
 0x62e   : > { %v2028_v61 = vpop.eup %2027 }
 0x62f   : > { %v1704_v1 = vrot.slane %v2028_v61, %v1703_v57 }
 0x631   : > { %v1709_v0 = vmul.f32 %v1704_v1, %v3541_v51  ;;  %v1711_v49 = vmul.f32 %v1704_v1, %v3542_v23 }
 0x632   : > { %v2030_v29 = vpop.eup %2029 }
 0x633   : > { %1713 = vst [vmem:[%s215_s29] sm:$0xff] %v1709_v0  ;;  %1715 = vst [vmem:[%s215_s29 + $0x10] sm:$0xff] %v1711_v49  ;;  %v1708_v63 = vrot.slane %v2030_v29, %v1703_v57 }
 0x635   : > { %v1710_v52 = vmul.f32 %v1708_v63, %v3543_v17  ;;  %v1712_v58 = vmul.f32 %v1708_v63, %v3544_v34 }
 0x637   : > { %1714 = vst [vmem:[%s215_s29 + $0x8] sm:$0xff] %v1710_v52  ;;  %1716 = vst [vmem:[%s215_s29 + $0x18] sm:$0xff] %v1712_v58 }
 0x638   : > { %2074 = shalt.err (!%p2071_p2)
}
 0x639   : > { %s2075_s26 = scalar_lea.hbm %s3398_s7, 512  ;;  %s2079_s11 = scalar_lea.hbm %s3450_s4, 1024 }
 0x63a   : > { %p2076_p4 = scmp.ne.s32.totalorder %s3398_s7, %s2075_s26  ;;  %p2080_p9 = scmp.lt.u32.totalorder %s3398_s7, %s3450_s4 }
 0x63b   : > { %p2081_p1 = scmp.lt.u32.totalorder %s2079_s11, %s2075_s26  ;;  %p2083_p6 = scmp.lt.u32.totalorder %s2075_s26, %s3398_s7 }
 0x63c   : > { %p2077_p5 = pnand %p2076_p4, %p3545_p11 }
 0x63d   : > { %p2082_p3 = por %p2081_p1, %p2080_p9 }
 0x63e   : > { %p2078_p7 = pneg %p2077_p5 }
 0x63f   : > { %p2084_p12 = por %p2083_p6, %p2082_p3 }
 0x641   : > { %p2085_p13 = pnand %p2084_p12, %p2078_p7 }
 0x643   : > { %2088 = shalt.err (!%p2085_p13)
}
 0x644   : > { %s2198_s25 = smov 256   ;;  %s2199_s29 = smov 16  }
 0x645   : > { %1851 = dma.vmem_to_hbm [thread:$0]  (%p3545_p11), %s3400_s30, 512, %s3398_s7, %s1718_s19, %s2198_s25, %s2198_s25, %s2199_s29  }
 0x646 PF: > { %s1746_s5 = sand.u32 1, %s2115_s15   ;;  %p3546_p8 = scmp.ne.s32.totalorder %s3477_s28, 0 }
 0x647   : > { %p3547_p10 = scmp.ge.s32.totalorder %s2127_s18, 2  ;;  %s1747_s6 = scalar_lea.sflag [#allocation4], %s1746_s5 }
 0x649   : > { %p1858_p0 = pnand %p3547_p10, %p3546_p8 }
 0x64b   : > { %2110 = dma.done.wait (!%p1858_p0), %s1747_s6, 512  }
 0x64c   : > { %2112 = vsyncadd (!%p1858_p0), %s1747_s6, 4294966784  ;;  %p17_p2 = scmp.ge.s32.totalorder %s2250_s21, 4   ;;  %s3548_s15 = smov %s2119_s16 }
 0x64d   : > { %s3549_s16 = smov %s2123_s17  ;;  %s3550_s17 = smov %s2262_s24 }
 0x64e   : > { %s3551_s18 = smov %s2250_s21  ;;  %19 = sbr.rel (!%p17_p2) target bundleno = 5 (0x5), region = 81 }
 0x655   :  { %1752 = vsyncpa [#allocation3], 1 }
 0x656   :  { %1754 = vsyncpa [#allocation3 + $0x1], 1 }
 0x657   :  { %1755 = vsyncpa [#allocation4], 1 }
 0x658   :  { %1757 = vsyncpa [#allocation4 + $0x1], 1 }

</bundles_post_ra>
